<compile_context>
chip_gen: v6e
topology: v6e:2x2x1
jax: 0.10.0
libtpu: 0.0.40
codegen_flags: <defaults>
</compile_context>

<pallas_src>
import functools

import jax
import jax.numpy as jnp
from jax.experimental import pallas as pl
from jax.experimental.pallas import tpu as pltpu

LN_EPS = 1e-5
NEG_SLOPE = 0.2


def _round_up(x, m):
    return (x + m - 1) // m * m


def _decoder_block_kernel(x_ref, w_ref, b_ref, m_ref, o_ref, *,
                          n_co, hw2, w2, spc, inv_n):
    # x_ref: (1, Ci, Pcols) bf16  pad-1 activation, padded spatial flat on lanes
    # w_ref: (8, Go, Ci)    bf16  per-tap, parity-grouped ConvTranspose3d weight
    # b_ref: (Go, 1)        f32   conv bias replicated per parity group
    # m_ref: (8, Spc)       f32   per-parity-group validity mask over columns
    # o_ref: (1, Go, Spc)   f32
    go = 8 * n_co
    xa = x_ref[0]                                   # (Ci, Pcols), read once

    # Transposed conv as 8 accumulated (Go, Ci) @ (Ci, Spc) MXU matmuls; each
    # tap is a contiguous static lane-slice of the flattened padded activation
    # (stride trick: column p + a*HW2 + b*W2 + c == padded voxel (pd+a,ph+b,pw+c)).
    acc = jnp.zeros((go, spc), jnp.float32)
    t = 0
    for ta in (0, 1):
        for tb in (0, 1):
            for tc in (0, 1):
                off = ta * hw2 + tb * w2 + tc
                xs = xa[:, off:off + spc]           # (Ci, Spc) bf16
                acc = acc + jnp.dot(w_ref[t], xs,
                                    preferred_element_type=jnp.float32)
                t += 1
    y = acc + b_ref[...]                            # lane-broadcast bias (f32)

    # LayerNorm over the valid elements only (fresh nn.LayerNorm every forward
    # => gamma=1, beta=0).  Two-pass, masked, f32; the (8, Spc) group mask is
    # broadcast over the Co sublanes of each parity group — the full-size mask
    # is never materialized.
    m = m_ref[...]
    s1 = jnp.float32(0.0)
    for g in range(8):
        s1 = s1 + jnp.sum(m[g:g + 1, :] * y[g * n_co:(g + 1) * n_co, :])
    mean = s1 * inv_n
    s2 = jnp.float32(0.0)
    for g in range(8):
        d = y[g * n_co:(g + 1) * n_co, :] - mean
        s2 = s2 + jnp.sum(m[g:g + 1, :] * (d * d))
    var = s2 * inv_n

    z = (y - mean) * jax.lax.rsqrt(var + LN_EPS)
    # LeakyReLU(0.2); invalid (waste) columns are dropped by the wrapper.
    o_ref[0] = jnp.where(z >= 0, z, jnp.float32(NEG_SLOPE) * z)


def decoder_block_forward(x, weight, bias):
    """x: (N, Ci, D, H, W) f32; weight: (Ci, Co, 4, 4, 4); bias: (Co,).
    Returns (N, Co, 2D, 2H, 2W) matching PyTorch DecoderBlock.forward."""
    N, Ci, D, H, W = x.shape
    Co = weight.shape[1]
    Go = 8 * Co
    H2, W2 = H + 2, W + 2
    HW2 = H2 * W2
    P2 = (D + 2) * HW2                       # full flattened padded grid
    spc_raw = (D + 1) * HW2                  # columns the kernel computes
    Spc = _round_up(spc_raw, 128)            # lane-dense column axis
    d_max = HW2 + W2 + 1                     # largest tap offset (a=b=c=1)
    Pcols = _round_up(Spc + d_max, 128)      # input columns incl. slice slack

    # ---- glue: pad-1 activation, channel-major, padded spatial flat on lanes ----
    x_pad = jnp.pad(x.astype(jnp.float32),
                    ((0, 0), (0, 0), (1, 1), (1, 1), (1, 1)))
    x_flat = x_pad.reshape(N, Ci, P2).astype(jnp.bfloat16)
    x_flat = jnp.pad(x_flat, ((0, 0), (0, 0), (0, Pcols - P2)))

    # ---- glue: per-tap parity-grouped weight (8, Go, Ci), bf16 ----
    # w_taps[t, g*Co+co, ci] = W[ci, co, 3-rd-2a, 3-rh-2b, 3-rw-2c]
    # with t=(a,b,c) the 2x2x2 tap and g=(rd,rh,rw) the output parity class.
    w32 = weight.astype(jnp.float32)
    taps = []
    for a in (0, 1):
        for b in (0, 1):
            for c in (0, 1):
                grp = []
                for rd in (0, 1):
                    for rh in (0, 1):
                        for rw in (0, 1):
                            grp.append(w32[:, :, 3 - rd - 2 * a,
                                           3 - rh - 2 * b,
                                           3 - rw - 2 * c].T)     # (Co, Ci)
                taps.append(jnp.concatenate(grp, axis=0))          # (Go, Ci)
    w_taps = jnp.stack(taps, axis=0).astype(jnp.bfloat16)          # (8, Go, Ci)
    bt = jnp.tile(bias.astype(jnp.float32), 8).reshape(Go, 1)

    # ---- glue: small (8, Spc) per-group validity mask (NOT output-sized) ----
    col = jnp.arange(Spc)
    pd = col // HW2
    ph = (col % HW2) // W2
    pw = col % W2
    rows = []
    for rd in (0, 1):
        for rh in (0, 1):
            for rw in (0, 1):
                rows.append((pd >= rd) & (pd < rd + D)
                            & (ph >= rh) & (ph < rh + H)
                            & (pw >= rw) & (pw < rw + W))
    gmask = jnp.stack(rows, axis=0).astype(jnp.float32)            # (8, Spc)

    inv_n = 1.0 / float(Co * 8 * D * H * W)   # == Co * (2D)*(2H)*(2W)
    kernel = functools.partial(_decoder_block_kernel, n_co=Co, hw2=HW2,
                               w2=W2, spc=Spc, inv_n=inv_n)

    out_flat = pl.pallas_call(
        kernel,
        out_shape=jax.ShapeDtypeStruct((N, Go, Spc), jnp.float32),
        grid=(N,),
        in_specs=[
            pl.BlockSpec((1, Ci, Pcols), lambda n: (n, 0, 0)),
            pl.BlockSpec((8, Go, Ci), lambda n: (0, 0, 0)),
            pl.BlockSpec((Go, 1), lambda n: (0, 0)),
            pl.BlockSpec((8, Spc), lambda n: (0, 0)),
        ],
        out_specs=pl.BlockSpec((1, Go, Spc), lambda n: (n, 0, 0)),
        compiler_params=pltpu.CompilerParams(
            dimension_semantics=("parallel",),
            # Plenty for these blocks; keep explicit (v5e scoped default is
            # only 16 MiB).  Cap below 48 MiB so the same number is also safe
            # on v7x's 64 MiB physical VMEM.
            vmem_limit_bytes=32 * 1024 * 1024,
        ),
    )(x_flat, w_taps, bt, gmask)

    # ---- glue: parity (depth-to-space) pixel-shuffle, no scatter writes ----
    y8 = out_flat[:, :, :spc_raw].reshape(N, 8, Co, D + 1, H2, W2)
    parts = []
    for rd in (0, 1):
        for rh in (0, 1):
            for rw in (0, 1):
                g = rd * 4 + rh * 2 + rw
                parts.append(y8[:, g, :, rd:rd + D, rh:rh + H, rw:rw + W])
    yp = jnp.stack(parts, axis=1).reshape(N, 2, 2, 2, Co, D, H, W)
    return jnp.transpose(yp, (0, 4, 5, 1, 6, 2, 7, 3)).reshape(
        N, Co, 2 * D, 2 * H, 2 * W)


def reference_forward(x, weight, bias):
    """Independent pure-JAX reference (direct scatter form of ConvTranspose3d)."""
    N, Ci, D, H, W = x.shape
    Co = weight.shape[1]
    Do, Ho, Wo = 2 * D, 2 * H, 2 * W
    y = jnp.zeros((N, Co, Do, Ho, Wo), jnp.float32)

    def rng(k, n):
        lo = 1 if k == 0 else 0
        hi = n - 1 if k == 3 else n
        return lo, hi

    for kd in range(4):
        dlo, dhi = rng(kd, D)
        for kh in range(4):
            hlo, hhi = rng(kh, H)
            for kw in range(4):
                wlo, whi = rng(kw, W)
                xs = x[:, :, dlo:dhi, hlo:hhi, wlo:whi]
                contrib = jnp.einsum('ncdhw,cf->nfdhw', xs,
                                     weight[:, :, kd, kh, kw],
                                     precision=jax.lax.Precision.HIGHEST)
                od0 = 2 * dlo - 1 + kd
                oh0 = 2 * hlo - 1 + kh
                ow0 = 2 * wlo - 1 + kw
                y = y.at[:, :,
                         od0:od0 + 2 * (dhi - dlo):2,
                         oh0:oh0 + 2 * (hhi - hlo):2,
                         ow0:ow0 + 2 * (whi - wlo):2].add(contrib)
    y = y + bias[None, :, None, None, None]
    mean = jnp.mean(y, axis=(1, 2, 3, 4), keepdims=True)
    var = jnp.mean((y - mean) ** 2, axis=(1, 2, 3, 4), keepdims=True)
    z = (y - mean) / jnp.sqrt(var + LN_EPS)
    return jnp.where(z >= 0, z, NEG_SLOPE * z)


if __name__ == "__main__":
    key = jax.random.PRNGKey(0)
    k1, k2, k3 = jax.random.split(key, 3)

    N, Ci, Co = 2, 4, 8
    D = H = W = 4

    x = jax.random.normal(k1, (N, Ci, D, H, W), jnp.float32)
    # PyTorch ConvTranspose3d weight shape: (in_channels, out_channels, kD, kH, kW)
    fan = Ci * 4 * 4 * 4
    weight = jax.random.normal(k2, (Ci, Co, 4, 4, 4), jnp.float32) / jnp.sqrt(float(fan))
    bias = 0.1 * jax.random.normal(k3, (Co,), jnp.float32)

    out = jax.block_until_ready(decoder_block_forward(x, weight, bias))
    assert out.shape == (N, Co, 2 * D, 2 * H, 2 * W)

    # Tight check: reference computed on the same bf16-rounded activation /
    # weight the kernel feeds to the MXU (f32 accumulation on both sides).
    x_q = x.astype(jnp.bfloat16).astype(jnp.float32)
    w_q = weight.astype(jnp.bfloat16).astype(jnp.float32)
    ref_q = reference_forward(x_q, w_q, bias)
    err_q = float(jnp.max(jnp.abs(out - ref_q)))
    assert jnp.allclose(out, ref_q, atol=2e-3, rtol=2e-3), f"max_err_vs_bf16_ref={err_q}"

    # Loose check vs. the full-f32 reference (gap = bf16 input rounding).
    ref = reference_forward(x, weight, bias)
    err = float(jnp.max(jnp.abs(out - ref)))
    assert jnp.allclose(out, ref, atol=5e-2, rtol=5e-2), f"max_err_vs_f32_ref={err}"

    print("KERNEL_OK")
</pallas_src>

<mosaic_0001>
module attributes {stable_mosaic.version = 11 : i64} {
  func.func @_decoder_block_kernel(%arg0: i32, %arg1: memref<1x4x384xbf16, #tpu.memory_space<vmem>>, %arg2: memref<8x64x4xbf16, #tpu.memory_space<vmem>>, %arg3: memref<64x1xf32, #tpu.memory_space<vmem>>, %arg4: memref<8x256xf32, #tpu.memory_space<vmem>>, %arg5: memref<1x64x256xf32, #tpu.memory_space<vmem>>) attributes {dimension_semantics = [#tpu.dimension_semantics<parallel>], iteration_bounds = array<i64: 2>, scalar_prefetch = 0 : i64, scratch_operands = 0 : i64, tpu.core_type = #tpu.core_type<tc>, window_params = [{transform_indices = @transform_0, window_bounds = array<i64: 1, 4, 384>}, {pipeline_mode = #tpu.pipeline_mode<synchronous>, transform_indices = @transform_1, window_bounds = array<i64: 8, 64, 4>}, {pipeline_mode = #tpu.pipeline_mode<synchronous>, transform_indices = @transform_2, window_bounds = array<i64: 64, 1>}, {pipeline_mode = #tpu.pipeline_mode<synchronous>, transform_indices = @transform_3, window_bounds = array<i64: 8, 256>}, {transform_indices = @transform_4, window_bounds = array<i64: 1, 64, 256>}]} {
    %c0 = arith.constant 0 : index
    %c0_0 = arith.constant 0 : index
    %c0_1 = arith.constant 0 : index
    %0 = vector.load %arg1[%c0, %c0_0, %c0_1] : memref<1x4x384xbf16, #tpu.memory_space<vmem>>, vector<1x4x384xbf16>
    %1 = vector.shape_cast %0 : vector<1x4x384xbf16> to vector<4x384xbf16>
    %cst = arith.constant 0.000000e+00 : f32
    %2 = vector.broadcast %cst : f32 to vector<64x256xf32>
    %3 = vector.extract_strided_slice %1 {offsets = [0, 0], sizes = [4, 256], strides = [1, 1]} : vector<4x384xbf16> to vector<4x256xbf16>
    %c0_2 = arith.constant 0 : index
    %c0_3 = arith.constant 0 : index
    %c0_4 = arith.constant 0 : index
    %4 = vector.load %arg2[%c0_2, %c0_3, %c0_4] : memref<8x64x4xbf16, #tpu.memory_space<vmem>>, vector<1x64x4xbf16>
    %5 = vector.shape_cast %4 : vector<1x64x4xbf16> to vector<64x4xbf16>
    %cst_5 = arith.constant dense<0.000000e+00> : vector<64x256xf32>
    %6 = tpu.matmul %5, %3, %cst_5 {dimension_numbers = #tpu.dot_dimension_numbers<[1], [0], [0], [1], [0, 0, 1, 1], [], []>} : vector<64x4xbf16>, vector<4x256xbf16>, vector<64x256xf32> -> vector<64x256xf32>
    %7 = arith.addf %2, %6 : vector<64x256xf32>
    %8 = vector.extract_strided_slice %1 {offsets = [0, 1], sizes = [4, 256], strides = [1, 1]} : vector<4x384xbf16> to vector<4x256xbf16>
    %c1 = arith.constant 1 : index
    %c0_6 = arith.constant 0 : index
    %c0_7 = arith.constant 0 : index
    %9 = vector.load %arg2[%c1, %c0_6, %c0_7] : memref<8x64x4xbf16, #tpu.memory_space<vmem>>, vector<1x64x4xbf16>
    %10 = vector.shape_cast %9 : vector<1x64x4xbf16> to vector<64x4xbf16>
    %cst_8 = arith.constant dense<0.000000e+00> : vector<64x256xf32>
    %11 = tpu.matmul %10, %8, %cst_8 {dimension_numbers = #tpu.dot_dimension_numbers<[1], [0], [0], [1], [0, 0, 1, 1], [], []>} : vector<64x4xbf16>, vector<4x256xbf16>, vector<64x256xf32> -> vector<64x256xf32>
    %12 = arith.addf %7, %11 : vector<64x256xf32>
    %13 = vector.extract_strided_slice %1 {offsets = [0, 6], sizes = [4, 256], strides = [1, 1]} : vector<4x384xbf16> to vector<4x256xbf16>
    %c2 = arith.constant 2 : index
    %c0_9 = arith.constant 0 : index
    %c0_10 = arith.constant 0 : index
    %14 = vector.load %arg2[%c2, %c0_9, %c0_10] : memref<8x64x4xbf16, #tpu.memory_space<vmem>>, vector<1x64x4xbf16>
    %15 = vector.shape_cast %14 : vector<1x64x4xbf16> to vector<64x4xbf16>
    %cst_11 = arith.constant dense<0.000000e+00> : vector<64x256xf32>
    %16 = tpu.matmul %15, %13, %cst_11 {dimension_numbers = #tpu.dot_dimension_numbers<[1], [0], [0], [1], [0, 0, 1, 1], [], []>} : vector<64x4xbf16>, vector<4x256xbf16>, vector<64x256xf32> -> vector<64x256xf32>
    %17 = arith.addf %12, %16 : vector<64x256xf32>
    %18 = vector.extract_strided_slice %1 {offsets = [0, 7], sizes = [4, 256], strides = [1, 1]} : vector<4x384xbf16> to vector<4x256xbf16>
    %c3 = arith.constant 3 : index
    %c0_12 = arith.constant 0 : index
    %c0_13 = arith.constant 0 : index
    %19 = vector.load %arg2[%c3, %c0_12, %c0_13] : memref<8x64x4xbf16, #tpu.memory_space<vmem>>, vector<1x64x4xbf16>
    %20 = vector.shape_cast %19 : vector<1x64x4xbf16> to vector<64x4xbf16>
    %cst_14 = arith.constant dense<0.000000e+00> : vector<64x256xf32>
    %21 = tpu.matmul %20, %18, %cst_14 {dimension_numbers = #tpu.dot_dimension_numbers<[1], [0], [0], [1], [0, 0, 1, 1], [], []>} : vector<64x4xbf16>, vector<4x256xbf16>, vector<64x256xf32> -> vector<64x256xf32>
    %22 = arith.addf %17, %21 : vector<64x256xf32>
    %23 = vector.extract_strided_slice %1 {offsets = [0, 36], sizes = [4, 256], strides = [1, 1]} : vector<4x384xbf16> to vector<4x256xbf16>
    %c4 = arith.constant 4 : index
    %c0_15 = arith.constant 0 : index
    %c0_16 = arith.constant 0 : index
    %24 = vector.load %arg2[%c4, %c0_15, %c0_16] : memref<8x64x4xbf16, #tpu.memory_space<vmem>>, vector<1x64x4xbf16>
    %25 = vector.shape_cast %24 : vector<1x64x4xbf16> to vector<64x4xbf16>
    %cst_17 = arith.constant dense<0.000000e+00> : vector<64x256xf32>
    %26 = tpu.matmul %25, %23, %cst_17 {dimension_numbers = #tpu.dot_dimension_numbers<[1], [0], [0], [1], [0, 0, 1, 1], [], []>} : vector<64x4xbf16>, vector<4x256xbf16>, vector<64x256xf32> -> vector<64x256xf32>
    %27 = arith.addf %22, %26 : vector<64x256xf32>
    %28 = vector.extract_strided_slice %1 {offsets = [0, 37], sizes = [4, 256], strides = [1, 1]} : vector<4x384xbf16> to vector<4x256xbf16>
    %c5 = arith.constant 5 : index
    %c0_18 = arith.constant 0 : index
    %c0_19 = arith.constant 0 : index
    %29 = vector.load %arg2[%c5, %c0_18, %c0_19] : memref<8x64x4xbf16, #tpu.memory_space<vmem>>, vector<1x64x4xbf16>
    %30 = vector.shape_cast %29 : vector<1x64x4xbf16> to vector<64x4xbf16>
    %cst_20 = arith.constant dense<0.000000e+00> : vector<64x256xf32>
    %31 = tpu.matmul %30, %28, %cst_20 {dimension_numbers = #tpu.dot_dimension_numbers<[1], [0], [0], [1], [0, 0, 1, 1], [], []>} : vector<64x4xbf16>, vector<4x256xbf16>, vector<64x256xf32> -> vector<64x256xf32>
    %32 = arith.addf %27, %31 : vector<64x256xf32>
    %33 = vector.extract_strided_slice %1 {offsets = [0, 42], sizes = [4, 256], strides = [1, 1]} : vector<4x384xbf16> to vector<4x256xbf16>
    %c6 = arith.constant 6 : index
    %c0_21 = arith.constant 0 : index
    %c0_22 = arith.constant 0 : index
    %34 = vector.load %arg2[%c6, %c0_21, %c0_22] : memref<8x64x4xbf16, #tpu.memory_space<vmem>>, vector<1x64x4xbf16>
    %35 = vector.shape_cast %34 : vector<1x64x4xbf16> to vector<64x4xbf16>
    %cst_23 = arith.constant dense<0.000000e+00> : vector<64x256xf32>
    %36 = tpu.matmul %35, %33, %cst_23 {dimension_numbers = #tpu.dot_dimension_numbers<[1], [0], [0], [1], [0, 0, 1, 1], [], []>} : vector<64x4xbf16>, vector<4x256xbf16>, vector<64x256xf32> -> vector<64x256xf32>
    %37 = arith.addf %32, %36 : vector<64x256xf32>
    %38 = vector.extract_strided_slice %1 {offsets = [0, 43], sizes = [4, 256], strides = [1, 1]} : vector<4x384xbf16> to vector<4x256xbf16>
    %c7 = arith.constant 7 : index
    %c0_24 = arith.constant 0 : index
    %c0_25 = arith.constant 0 : index
    %39 = vector.load %arg2[%c7, %c0_24, %c0_25] : memref<8x64x4xbf16, #tpu.memory_space<vmem>>, vector<1x64x4xbf16>
    %40 = vector.shape_cast %39 : vector<1x64x4xbf16> to vector<64x4xbf16>
    %cst_26 = arith.constant dense<0.000000e+00> : vector<64x256xf32>
    %41 = tpu.matmul %40, %38, %cst_26 {dimension_numbers = #tpu.dot_dimension_numbers<[1], [0], [0], [1], [0, 0, 1, 1], [], []>} : vector<64x4xbf16>, vector<4x256xbf16>, vector<64x256xf32> -> vector<64x256xf32>
    %42 = arith.addf %37, %41 : vector<64x256xf32>
    %c0_27 = arith.constant 0 : index
    %c0_28 = arith.constant 0 : index
    %43 = vector.load %arg3[%c0_27, %c0_28] : memref<64x1xf32, #tpu.memory_space<vmem>>, vector<64x1xf32>
    %44 = vector.broadcast %43 : vector<64x1xf32> to vector<64x256xf32>
    %45 = arith.addf %42, %44 : vector<64x256xf32>
    %c0_29 = arith.constant 0 : index
    %c0_30 = arith.constant 0 : index
    %46 = vector.load %arg4[%c0_29, %c0_30] : memref<8x256xf32, #tpu.memory_space<vmem>>, vector<8x256xf32>
    %47 = vector.extract_strided_slice %46 {offsets = [0, 0], sizes = [1, 256], strides = [1, 1]} : vector<8x256xf32> to vector<1x256xf32>
    %48 = vector.extract_strided_slice %45 {offsets = [0, 0], sizes = [8, 256], strides = [1, 1]} : vector<64x256xf32> to vector<8x256xf32>
    %49 = vector.broadcast %47 : vector<1x256xf32> to vector<8x256xf32>
    %50 = arith.mulf %49, %48 : vector<8x256xf32>
    %51 = vector.shape_cast %50 : vector<8x256xf32> to vector<1x8x256xf32>
    %cst_31 = arith.constant dense<0.000000e+00> : vector<1xf32>
    %52 = vector.multi_reduction <add>, %51, %cst_31 [1, 2] : vector<1x8x256xf32> to vector<1xf32>
    %53 = vector.shape_cast %52 : vector<1xf32> to vector<1x1x1xf32>
    %54 = vector.extract %53[0, 0, 0] : f32 from vector<1x1x1xf32>
    %cst_32 = arith.constant 0.000000e+00 : f32
    %55 = arith.addf %cst_32, %54 : f32
    %56 = vector.extract_strided_slice %46 {offsets = [1, 0], sizes = [1, 256], strides = [1, 1]} : vector<8x256xf32> to vector<1x256xf32>
    %57 = vector.extract_strided_slice %45 {offsets = [8, 0], sizes = [8, 256], strides = [1, 1]} : vector<64x256xf32> to vector<8x256xf32>
    %58 = vector.broadcast %56 : vector<1x256xf32> to vector<8x256xf32>
    %59 = arith.mulf %58, %57 : vector<8x256xf32>
    %60 = vector.shape_cast %59 : vector<8x256xf32> to vector<1x8x256xf32>
    %cst_33 = arith.constant dense<0.000000e+00> : vector<1xf32>
    %61 = vector.multi_reduction <add>, %60, %cst_33 [1, 2] : vector<1x8x256xf32> to vector<1xf32>
    %62 = vector.shape_cast %61 : vector<1xf32> to vector<1x1x1xf32>
    %63 = vector.extract %62[0, 0, 0] : f32 from vector<1x1x1xf32>
    %64 = arith.addf %55, %63 : f32
    %65 = vector.extract_strided_slice %46 {offsets = [2, 0], sizes = [1, 256], strides = [1, 1]} : vector<8x256xf32> to vector<1x256xf32>
    %66 = vector.extract_strided_slice %45 {offsets = [16, 0], sizes = [8, 256], strides = [1, 1]} : vector<64x256xf32> to vector<8x256xf32>
    %67 = vector.broadcast %65 : vector<1x256xf32> to vector<8x256xf32>
    %68 = arith.mulf %67, %66 : vector<8x256xf32>
    %69 = vector.shape_cast %68 : vector<8x256xf32> to vector<1x8x256xf32>
    %cst_34 = arith.constant dense<0.000000e+00> : vector<1xf32>
    %70 = vector.multi_reduction <add>, %69, %cst_34 [1, 2] : vector<1x8x256xf32> to vector<1xf32>
    %71 = vector.shape_cast %70 : vector<1xf32> to vector<1x1x1xf32>
    %72 = vector.extract %71[0, 0, 0] : f32 from vector<1x1x1xf32>
    %73 = arith.addf %64, %72 : f32
    %74 = vector.extract_strided_slice %46 {offsets = [3, 0], sizes = [1, 256], strides = [1, 1]} : vector<8x256xf32> to vector<1x256xf32>
    %75 = vector.extract_strided_slice %45 {offsets = [24, 0], sizes = [8, 256], strides = [1, 1]} : vector<64x256xf32> to vector<8x256xf32>
    %76 = vector.broadcast %74 : vector<1x256xf32> to vector<8x256xf32>
    %77 = arith.mulf %76, %75 : vector<8x256xf32>
    %78 = vector.shape_cast %77 : vector<8x256xf32> to vector<1x8x256xf32>
    %cst_35 = arith.constant dense<0.000000e+00> : vector<1xf32>
    %79 = vector.multi_reduction <add>, %78, %cst_35 [1, 2] : vector<1x8x256xf32> to vector<1xf32>
    %80 = vector.shape_cast %79 : vector<1xf32> to vector<1x1x1xf32>
    %81 = vector.extract %80[0, 0, 0] : f32 from vector<1x1x1xf32>
    %82 = arith.addf %73, %81 : f32
    %83 = vector.extract_strided_slice %46 {offsets = [4, 0], sizes = [1, 256], strides = [1, 1]} : vector<8x256xf32> to vector<1x256xf32>
    %84 = vector.extract_strided_slice %45 {offsets = [32, 0], sizes = [8, 256], strides = [1, 1]} : vector<64x256xf32> to vector<8x256xf32>
    %85 = vector.broadcast %83 : vector<1x256xf32> to vector<8x256xf32>
    %86 = arith.mulf %85, %84 : vector<8x256xf32>
    %87 = vector.shape_cast %86 : vector<8x256xf32> to vector<1x8x256xf32>
    %cst_36 = arith.constant dense<0.000000e+00> : vector<1xf32>
    %88 = vector.multi_reduction <add>, %87, %cst_36 [1, 2] : vector<1x8x256xf32> to vector<1xf32>
    %89 = vector.shape_cast %88 : vector<1xf32> to vector<1x1x1xf32>
    %90 = vector.extract %89[0, 0, 0] : f32 from vector<1x1x1xf32>
    %91 = arith.addf %82, %90 : f32
    %92 = vector.extract_strided_slice %46 {offsets = [5, 0], sizes = [1, 256], strides = [1, 1]} : vector<8x256xf32> to vector<1x256xf32>
    %93 = vector.extract_strided_slice %45 {offsets = [40, 0], sizes = [8, 256], strides = [1, 1]} : vector<64x256xf32> to vector<8x256xf32>
    %94 = vector.broadcast %92 : vector<1x256xf32> to vector<8x256xf32>
    %95 = arith.mulf %94, %93 : vector<8x256xf32>
    %96 = vector.shape_cast %95 : vector<8x256xf32> to vector<1x8x256xf32>
    %cst_37 = arith.constant dense<0.000000e+00> : vector<1xf32>
    %97 = vector.multi_reduction <add>, %96, %cst_37 [1, 2] : vector<1x8x256xf32> to vector<1xf32>
    %98 = vector.shape_cast %97 : vector<1xf32> to vector<1x1x1xf32>
    %99 = vector.extract %98[0, 0, 0] : f32 from vector<1x1x1xf32>
    %100 = arith.addf %91, %99 : f32
    %101 = vector.extract_strided_slice %46 {offsets = [6, 0], sizes = [1, 256], strides = [1, 1]} : vector<8x256xf32> to vector<1x256xf32>
    %102 = vector.extract_strided_slice %45 {offsets = [48, 0], sizes = [8, 256], strides = [1, 1]} : vector<64x256xf32> to vector<8x256xf32>
    %103 = vector.broadcast %101 : vector<1x256xf32> to vector<8x256xf32>
    %104 = arith.mulf %103, %102 : vector<8x256xf32>
    %105 = vector.shape_cast %104 : vector<8x256xf32> to vector<1x8x256xf32>
    %cst_38 = arith.constant dense<0.000000e+00> : vector<1xf32>
    %106 = vector.multi_reduction <add>, %105, %cst_38 [1, 2] : vector<1x8x256xf32> to vector<1xf32>
    %107 = vector.shape_cast %106 : vector<1xf32> to vector<1x1x1xf32>
    %108 = vector.extract %107[0, 0, 0] : f32 from vector<1x1x1xf32>
    %109 = arith.addf %100, %108 : f32
    %110 = vector.extract_strided_slice %46 {offsets = [7, 0], sizes = [1, 256], strides = [1, 1]} : vector<8x256xf32> to vector<1x256xf32>
    %111 = vector.extract_strided_slice %45 {offsets = [56, 0], sizes = [8, 256], strides = [1, 1]} : vector<64x256xf32> to vector<8x256xf32>
    %112 = vector.broadcast %110 : vector<1x256xf32> to vector<8x256xf32>
    %113 = arith.mulf %112, %111 : vector<8x256xf32>
    %114 = vector.shape_cast %113 : vector<8x256xf32> to vector<1x8x256xf32>
    %cst_39 = arith.constant dense<0.000000e+00> : vector<1xf32>
    %115 = vector.multi_reduction <add>, %114, %cst_39 [1, 2] : vector<1x8x256xf32> to vector<1xf32>
    %116 = vector.shape_cast %115 : vector<1xf32> to vector<1x1x1xf32>
    %117 = vector.extract %116[0, 0, 0] : f32 from vector<1x1x1xf32>
    %118 = arith.addf %109, %117 : f32
    %cst_40 = arith.constant 2.44140625E-4 : f32
    %119 = arith.mulf %118, %cst_40 : f32
    %120 = vector.extract_strided_slice %45 {offsets = [0, 0], sizes = [8, 256], strides = [1, 1]} : vector<64x256xf32> to vector<8x256xf32>
    %121 = vector.broadcast %119 : f32 to vector<8x256xf32>
    %122 = arith.subf %120, %121 : vector<8x256xf32>
    %123 = vector.extract_strided_slice %46 {offsets = [0, 0], sizes = [1, 256], strides = [1, 1]} : vector<8x256xf32> to vector<1x256xf32>
    %124 = arith.mulf %122, %122 : vector<8x256xf32>
    %125 = vector.broadcast %123 : vector<1x256xf32> to vector<8x256xf32>
    %126 = arith.mulf %125, %124 : vector<8x256xf32>
    %127 = vector.shape_cast %126 : vector<8x256xf32> to vector<1x8x256xf32>
    %cst_41 = arith.constant dense<0.000000e+00> : vector<1xf32>
    %128 = vector.multi_reduction <add>, %127, %cst_41 [1, 2] : vector<1x8x256xf32> to vector<1xf32>
    %129 = vector.shape_cast %128 : vector<1xf32> to vector<1x1x1xf32>
    %130 = vector.extract %129[0, 0, 0] : f32 from vector<1x1x1xf32>
    %cst_42 = arith.constant 0.000000e+00 : f32
    %131 = arith.addf %cst_42, %130 : f32
    %132 = vector.extract_strided_slice %45 {offsets = [8, 0], sizes = [8, 256], strides = [1, 1]} : vector<64x256xf32> to vector<8x256xf32>
    %133 = vector.broadcast %119 : f32 to vector<8x256xf32>
    %134 = arith.subf %132, %133 : vector<8x256xf32>
    %135 = vector.extract_strided_slice %46 {offsets = [1, 0], sizes = [1, 256], strides = [1, 1]} : vector<8x256xf32> to vector<1x256xf32>
    %136 = arith.mulf %134, %134 : vector<8x256xf32>
    %137 = vector.broadcast %135 : vector<1x256xf32> to vector<8x256xf32>
    %138 = arith.mulf %137, %136 : vector<8x256xf32>
    %139 = vector.shape_cast %138 : vector<8x256xf32> to vector<1x8x256xf32>
    %cst_43 = arith.constant dense<0.000000e+00> : vector<1xf32>
    %140 = vector.multi_reduction <add>, %139, %cst_43 [1, 2] : vector<1x8x256xf32> to vector<1xf32>
    %141 = vector.shape_cast %140 : vector<1xf32> to vector<1x1x1xf32>
    %142 = vector.extract %141[0, 0, 0] : f32 from vector<1x1x1xf32>
    %143 = arith.addf %131, %142 : f32
    %144 = vector.extract_strided_slice %45 {offsets = [16, 0], sizes = [8, 256], strides = [1, 1]} : vector<64x256xf32> to vector<8x256xf32>
    %145 = vector.broadcast %119 : f32 to vector<8x256xf32>
    %146 = arith.subf %144, %145 : vector<8x256xf32>
    %147 = vector.extract_strided_slice %46 {offsets = [2, 0], sizes = [1, 256], strides = [1, 1]} : vector<8x256xf32> to vector<1x256xf32>
    %148 = arith.mulf %146, %146 : vector<8x256xf32>
    %149 = vector.broadcast %147 : vector<1x256xf32> to vector<8x256xf32>
    %150 = arith.mulf %149, %148 : vector<8x256xf32>
    %151 = vector.shape_cast %150 : vector<8x256xf32> to vector<1x8x256xf32>
    %cst_44 = arith.constant dense<0.000000e+00> : vector<1xf32>
    %152 = vector.multi_reduction <add>, %151, %cst_44 [1, 2] : vector<1x8x256xf32> to vector<1xf32>
    %153 = vector.shape_cast %152 : vector<1xf32> to vector<1x1x1xf32>
    %154 = vector.extract %153[0, 0, 0] : f32 from vector<1x1x1xf32>
    %155 = arith.addf %143, %154 : f32
    %156 = vector.extract_strided_slice %45 {offsets = [24, 0], sizes = [8, 256], strides = [1, 1]} : vector<64x256xf32> to vector<8x256xf32>
    %157 = vector.broadcast %119 : f32 to vector<8x256xf32>
    %158 = arith.subf %156, %157 : vector<8x256xf32>
    %159 = vector.extract_strided_slice %46 {offsets = [3, 0], sizes = [1, 256], strides = [1, 1]} : vector<8x256xf32> to vector<1x256xf32>
    %160 = arith.mulf %158, %158 : vector<8x256xf32>
    %161 = vector.broadcast %159 : vector<1x256xf32> to vector<8x256xf32>
    %162 = arith.mulf %161, %160 : vector<8x256xf32>
    %163 = vector.shape_cast %162 : vector<8x256xf32> to vector<1x8x256xf32>
    %cst_45 = arith.constant dense<0.000000e+00> : vector<1xf32>
    %164 = vector.multi_reduction <add>, %163, %cst_45 [1, 2] : vector<1x8x256xf32> to vector<1xf32>
    %165 = vector.shape_cast %164 : vector<1xf32> to vector<1x1x1xf32>
    %166 = vector.extract %165[0, 0, 0] : f32 from vector<1x1x1xf32>
    %167 = arith.addf %155, %166 : f32
    %168 = vector.extract_strided_slice %45 {offsets = [32, 0], sizes = [8, 256], strides = [1, 1]} : vector<64x256xf32> to vector<8x256xf32>
    %169 = vector.broadcast %119 : f32 to vector<8x256xf32>
    %170 = arith.subf %168, %169 : vector<8x256xf32>
    %171 = vector.extract_strided_slice %46 {offsets = [4, 0], sizes = [1, 256], strides = [1, 1]} : vector<8x256xf32> to vector<1x256xf32>
    %172 = arith.mulf %170, %170 : vector<8x256xf32>
    %173 = vector.broadcast %171 : vector<1x256xf32> to vector<8x256xf32>
    %174 = arith.mulf %173, %172 : vector<8x256xf32>
    %175 = vector.shape_cast %174 : vector<8x256xf32> to vector<1x8x256xf32>
    %cst_46 = arith.constant dense<0.000000e+00> : vector<1xf32>
    %176 = vector.multi_reduction <add>, %175, %cst_46 [1, 2] : vector<1x8x256xf32> to vector<1xf32>
    %177 = vector.shape_cast %176 : vector<1xf32> to vector<1x1x1xf32>
    %178 = vector.extract %177[0, 0, 0] : f32 from vector<1x1x1xf32>
    %179 = arith.addf %167, %178 : f32
    %180 = vector.extract_strided_slice %45 {offsets = [40, 0], sizes = [8, 256], strides = [1, 1]} : vector<64x256xf32> to vector<8x256xf32>
    %181 = vector.broadcast %119 : f32 to vector<8x256xf32>
    %182 = arith.subf %180, %181 : vector<8x256xf32>
    %183 = vector.extract_strided_slice %46 {offsets = [5, 0], sizes = [1, 256], strides = [1, 1]} : vector<8x256xf32> to vector<1x256xf32>
    %184 = arith.mulf %182, %182 : vector<8x256xf32>
    %185 = vector.broadcast %183 : vector<1x256xf32> to vector<8x256xf32>
    %186 = arith.mulf %185, %184 : vector<8x256xf32>
    %187 = vector.shape_cast %186 : vector<8x256xf32> to vector<1x8x256xf32>
    %cst_47 = arith.constant dense<0.000000e+00> : vector<1xf32>
    %188 = vector.multi_reduction <add>, %187, %cst_47 [1, 2] : vector<1x8x256xf32> to vector<1xf32>
    %189 = vector.shape_cast %188 : vector<1xf32> to vector<1x1x1xf32>
    %190 = vector.extract %189[0, 0, 0] : f32 from vector<1x1x1xf32>
    %191 = arith.addf %179, %190 : f32
    %192 = vector.extract_strided_slice %45 {offsets = [48, 0], sizes = [8, 256], strides = [1, 1]} : vector<64x256xf32> to vector<8x256xf32>
    %193 = vector.broadcast %119 : f32 to vector<8x256xf32>
    %194 = arith.subf %192, %193 : vector<8x256xf32>
    %195 = vector.extract_strided_slice %46 {offsets = [6, 0], sizes = [1, 256], strides = [1, 1]} : vector<8x256xf32> to vector<1x256xf32>
    %196 = arith.mulf %194, %194 : vector<8x256xf32>
    %197 = vector.broadcast %195 : vector<1x256xf32> to vector<8x256xf32>
    %198 = arith.mulf %197, %196 : vector<8x256xf32>
    %199 = vector.shape_cast %198 : vector<8x256xf32> to vector<1x8x256xf32>
    %cst_48 = arith.constant dense<0.000000e+00> : vector<1xf32>
    %200 = vector.multi_reduction <add>, %199, %cst_48 [1, 2] : vector<1x8x256xf32> to vector<1xf32>
    %201 = vector.shape_cast %200 : vector<1xf32> to vector<1x1x1xf32>
    %202 = vector.extract %201[0, 0, 0] : f32 from vector<1x1x1xf32>
    %203 = arith.addf %191, %202 : f32
    %204 = vector.extract_strided_slice %45 {offsets = [56, 0], sizes = [8, 256], strides = [1, 1]} : vector<64x256xf32> to vector<8x256xf32>
    %205 = vector.broadcast %119 : f32 to vector<8x256xf32>
    %206 = arith.subf %204, %205 : vector<8x256xf32>
    %207 = vector.extract_strided_slice %46 {offsets = [7, 0], sizes = [1, 256], strides = [1, 1]} : vector<8x256xf32> to vector<1x256xf32>
    %208 = arith.mulf %206, %206 : vector<8x256xf32>
    %209 = vector.broadcast %207 : vector<1x256xf32> to vector<8x256xf32>
    %210 = arith.mulf %209, %208 : vector<8x256xf32>
    %211 = vector.shape_cast %210 : vector<8x256xf32> to vector<1x8x256xf32>
    %cst_49 = arith.constant dense<0.000000e+00> : vector<1xf32>
    %212 = vector.multi_reduction <add>, %211, %cst_49 [1, 2] : vector<1x8x256xf32> to vector<1xf32>
    %213 = vector.shape_cast %212 : vector<1xf32> to vector<1x1x1xf32>
    %214 = vector.extract %213[0, 0, 0] : f32 from vector<1x1x1xf32>
    %215 = arith.addf %203, %214 : f32
    %cst_50 = arith.constant 2.44140625E-4 : f32
    %216 = arith.mulf %215, %cst_50 : f32
    %217 = vector.broadcast %119 : f32 to vector<64x256xf32>
    %218 = arith.subf %45, %217 : vector<64x256xf32>
    %cst_51 = arith.constant 9.99999974E-6 : f32
    %219 = arith.addf %216, %cst_51 : f32
    %220 = math.rsqrt %219 : f32
    %221 = vector.broadcast %220 : f32 to vector<64x256xf32>
    %222 = arith.mulf %218, %221 : vector<64x256xf32>
    %cst_52 = arith.constant 0.000000e+00 : f32
    %223 = vector.broadcast %cst_52 : f32 to vector<64x256xf32>
    %224 = arith.cmpf oge, %222, %223 : vector<64x256xf32>
    %cst_53 = arith.constant 2.000000e-01 : f32
    %225 = vector.broadcast %cst_53 : f32 to vector<64x256xf32>
    %226 = arith.mulf %225, %222 : vector<64x256xf32>
    %227 = arith.select %224, %222, %226 : vector<64x256xi1>, vector<64x256xf32>
    %c0_54 = arith.constant 0 : index
    %c0_55 = arith.constant 0 : index
    %c0_56 = arith.constant 0 : index
    %228 = vector.load %arg5[%c0_54, %c0_55, %c0_56] : memref<1x64x256xf32, #tpu.memory_space<vmem>>, vector<1x64x256xf32>
    %229 = vector.shape_cast %228 : vector<1x64x256xf32> to vector<64x256xf32>
    %230 = vector.shape_cast %227 : vector<64x256xf32> to vector<1x64x256xf32>
    tpu.vector_store %arg5[%c0_54, %c0_55, %c0_56], %230 {strides = array<i32>} : memref<1x64x256xf32, #tpu.memory_space<vmem>>, vector<1x64x256xf32>,
    return
  }
  func.func @transform_0(%arg0: i32) -> (i32, i32, i32) {
    %c0_i32 = arith.constant 0 : i32
    %c0_i32_0 = arith.constant 0 : i32
    %c0_i32_1 = arith.constant 0 : i32
    return %arg0, %c0_i32, %c0_i32_0 : i32, i32, i32
  }
  func.func @transform_1(%arg0: i32) -> (i32, i32, i32) {
    %c0_i32 = arith.constant 0 : i32
    %c0_i32_0 = arith.constant 0 : i32
    %c0_i32_1 = arith.constant 0 : i32
    %c0_i32_2 = arith.constant 0 : i32
    return %c0_i32, %c0_i32_0, %c0_i32_1 : i32, i32, i32
  }
  func.func @transform_2(%arg0: i32) -> (i32, i32) {
    %c0_i32 = arith.constant 0 : i32
    %c0_i32_0 = arith.constant 0 : i32
    %c0_i32_1 = arith.constant 0 : i32
    return %c0_i32, %c0_i32_0 : i32, i32
  }
  func.func @transform_3(%arg0: i32) -> (i32, i32) {
    %c0_i32 = arith.constant 0 : i32
    %c0_i32_0 = arith.constant 0 : i32
    %c0_i32_1 = arith.constant 0 : i32
    return %c0_i32, %c0_i32_0 : i32, i32
  }
  func.func @transform_4(%arg0: i32) -> (i32, i32, i32) {
    %c0_i32 = arith.constant 0 : i32
    %c0_i32_0 = arith.constant 0 : i32
    %c0_i32_1 = arith.constant 0 : i32
    return %arg0, %c0_i32, %c0_i32_0 : i32, i32, i32
  }
}

</mosaic_0001>

<bundles_post_ra>
// kernel: tpu_custom_call.1
= control target key start
LH: loop header
LB: loop body
LE: loop exit
PB: predicated region body
PF: predicated region fallthrough
CT: control target
= control target key end

     0   :  { %9 = vsyncpa [#allocation3], 0  ;;  %s3153_s0 = inlined_call_operand.vmem [shape: bf16[2,4,384], index: 0, kind: input, shape index: {}]   ;;  %s3154_s1 = inlined_call_operand.vmem [shape: bf16[8,64,4], index: 1, kind: input, shape index: {}]   ;;  %s3155_s2 = inlined_call_operand.vmem [shape: f32[64,1], index: 2, kind: input, shape index: {}]   ;;  %s3156_s3 = inlined_call_operand.vmem [shape: f32[8,256], index: 3, kind: input, shape index: {}]   ;;  %s3157_s4 = inlined_call_operand.hbm [shape: f32[2,64,256], index: 4, kind: output, shape index: {}]  }
   0x1   :  { %11 = vsyncpa [#allocation3 + $0x1], 0  ;;  %s2230_s15 = smov 0   ;;  %s2232_s16 = smov 0  }
   0x2   :  { %s2234_s17 = smov 0   ;;  %s2236_s18 = smov 0  }
   0x3 LB: > { %s2251_s19 = sadd.s32 4294967295, %s2191_s18   ;;  %s1869_s20 = sadd.s32 4294967294, %s2191_s18   ;;  %s2191_s18 = sphi %s2236_s18, %s3262_s18   ;;  %s2187_s17 = sphi %s2234_s17, %s3261_s17   ;;  %s2183_s16 = sphi %s2232_s16, %s3260_s16   ;;  %s2179_s15 = sphi %s2230_s15, %s3259_s15  }
   0x4   : > { %s2255_s21 = sadd.s32 1, %s2191_s18   ;;  %s113_s22 = sadd.s32 1, %s2187_s17 }
   0x5   : > { %s110_s23 = ssub.s32 %s2191_s18, %s2255_s21  ;;  %p123_p0 = scmp.ne.s32.totalorder %s2187_s17, %s2183_s16 }
   0x6   : > { %p111_p1 = scmp.eq.s32.totalorder %s110_s23, 0  ;;  %p124_p2 = scmp.eq.s32.totalorder %s2251_s19, 1 }
   0x7   : > { %p129_p3 = scmp.ne.s32.totalorder %s2183_s16, %s2179_s15  ;;  %p130_p4 = scmp.eq.s32.totalorder %s1869_s20, 1 }
   0x8   : > { %s2266_s24 = scalar_select %p111_p1, %s2187_s17, %s113_s22  }
   0x9   : > { %p2268_p5 = por %p124_p2, %p123_p0  ;;  %p2272_p6 = por %p130_p4, %p129_p3 }
   0xa   : > { %p1872_p7 = scmp.ge.s32.totalorder %s2191_s18, 1  ;;  %p165_p8 = scmp.lt.s32.totalorder %s2191_s18, 3 }
   0xc   : > { %p166_p9 = pnand %p1872_p7, %p165_p8 }
   0xe   : > { %169 = sbr.rel (%p166_p9) target bundleno = 1016 (0x3f8), region = 36 }
  0x13   : > { %p191_p10 = scmp.lt.s32.totalorder %s2251_s19, 1  ;;  %v240_v0 = vlaneseq  ;;  %v2193_v1 = vmov 1983009808   ;;  %v2194_v4 = vmov 0   ;;  %vm274_vm0 = vcmask 1041408   ;;  %s2195_s6 = smov 127  }
  0x14   : > { %v238_v2 = vunpack.c.l.s4 %v2193_v1  ;;  %313 = vmatprep.mubr.bf16.mxu0 %v2194_v4  ;;  %424 = vmatprep.mubr.bf16.mxu1 %v2194_v4  ;;  %vm261_vm1 = vcmask 31744   ;;  %v2098_v13 = vld [vmem:[%s3154_s1] sm:$0xff]   ;;  %s2196_s9 = smov 122   ;;  %s2197_s10 = smov 121   ;;  %v2100_v14 = vld [vmem:[%s3154_s1 + $0x8] sm:$0xff]   ;;  %v2102_v15 = vld [vmem:[%s3154_s1 + $0x10] sm:$0xff]  }
  0x15   : > { %s192_s27 = scalar_select %p191_p10, %s2251_s19, 1  ;;  %v2280_v3 = vshrl.u32 %v240_v0, 7  ;;  %2094 = vset.pattern.permute.xlu1 %v2194_v4  ;;  %2095 = vset.pattern.permute.xlu0 %v2194_v4  ;;  %v2104_v16 = vld [vmem:[%s3154_s1 + $0x18] sm:$0xff]   ;;  %vm258_vm2 = vcmask 1039360   ;;  %v1335_v19 = vld [vmem:[%s3155_s2] sm:$0xff]  ;;  %v1336_v20 = vld [vmem:[%s3155_s2 + $0x8] sm:$0xff] }
  0x16   : > { %v239_v5 = vunpack.c.0.s8 %v238_v2  ;;  %s2198_s13 = smov 92   ;;  %s2199_s22 = smov 91   ;;  %v1337_v22 = vld [vmem:[%s3155_s2 + $0x10] sm:$0xff]  ;;  %v1339_v25 = vld [vmem:[%s3155_s2 + $0x20] sm:$0xff]  ;;  %v1338_v30 = vld [vmem:[%s3155_s2 + $0x18] sm:$0xff]  ;;  %vm500_vm3 = vcmask 998400  }
  0x17   : > { %s2009_s28 = smul.u32 6, %s192_s27  ;;  %s2201_s29 = smov 85   ;;  %v2097_v28 = vld [vmem:[%s3154_s1 + $0x20] sm:$0xff]   ;;  %vm645_vm4 = vcmask 990208   ;;  %v1340_v33 = vld [vmem:[%s3155_s2 + $0x28] sm:$0xff]  ;;  %v1342_v43 = vld [vmem:[%s3155_s2 + $0x38] sm:$0xff] }
  0x18   : > { %v242_v6 = vsub.s32 %v239_v5, %v2280_v3  ;;  %v2099_v38 = vld [vmem:[%s3154_s1 + $0x28] sm:$0xff]   ;;  %v2106_v45 = vld [vmem:[%s3154_s1 + $0x60] sm:$0xff]   ;;  %vm790_vm5 = vcmask 752640   ;;  %v2101_v47 = vld [vmem:[%s3154_s1 + $0x30] sm:$0xff]   ;;  %vm935_vm6 = vcmask 744448   ;;  %vm1080_vm7 = vcmask 703488  }
  0x19   : > { %s195_s5 = scalar_lea.vmem %s3153_s0, %s2009_s28  ;;  %s2200_s28 = smov 86   ;;  %v2108_v52 = vld [vmem:[%s3154_s1 + $0x68] sm:$0xff]   ;;  %v2103_v57 = vld [vmem:[%s3154_s1 + $0x38] sm:$0xff]   ;;  %v2110_v60 = vld [vmem:[%s3154_s1 + $0x70] sm:$0xff]   ;;  %vm1225_vm8 = vcmask 695296  }
  0x1a   : > { %v197_v7 = vld [vmem:[%s195_s5] sm:$0x3f] }
  0x1b   : > { %v243_v8 = vrot.slane %v197_v7, %v242_v6  ;;  %v236_v9 = vcombine.high %v197_v7, %v197_v7  ;;  %v2105_v0 = vld [vmem:[%s3154_s1 + $0x40] sm:$0xff]  }
  0x1d   : > { %252 = vrot.lane.b32.xlu0 %v243_v8, %s2195_s6  ;;  %v250_v10 = vrot.slane %v236_v9, %v242_v6  ;;  %v251_v11 = vcombine.high %v243_v8, %v243_v8  ;;  %v387_v12 = vsel %vm274_vm0, %v243_v8, 0  ;;  %v2107_v9 = vld [vmem:[%s3154_s1 + $0x48] sm:$0xff]  }
  0x1f   : > { %256 = vrot.lane.b32.xlu1 %v250_v10, %s2195_s6  ;;  %1896 = vmatprep.subr.msk.bf16.mxu1 %vm274_vm0, %v251_v11 }
  0x20   : > { %407 = vmatpush1.bf16.msra.mxu1 %v387_v12 }
  0x21   : > { %254 = vrot.lane.b32.xlu0 %v251_v11, %s2195_s6 }
  0x23   : > { %494 = vrot.lane.b32.xlu1 %v243_v8, %s2196_s9  ;;  %1897 = vmatmul.mubr.msk.bf16.vlgmr.msra.gmra.mxu1 %vm261_vm1, %v2098_v13  ;;  %v2109_v13 = vld [vmem:[%s3154_s1 + $0x50] sm:$0xff]  }
  0x24   : > { %434 = vmatprep.mubr.bf16.mxu1 %v2194_v4 }
  0x25   : > { %639 = vrot.lane.b32.xlu0 %v243_v8, %s2197_s10 }
  0x27   : > { %498 = vrot.lane.b32.xlu1 %v250_v10, %s2196_s9 }
  0x29   : > { %496 = vrot.lane.b32.xlu0 %v251_v11, %s2196_s9 }
  0x2b   : > { %641 = vrot.lane.b32.xlu1 %v251_v11, %s2197_s10  ;;  %1898 = vmatmul.mubr.msk.bf16.gmra.mxu1 %vm261_vm1, %v2100_v14  ;;  %v2116_v14 = vld [vmem:[%s3154_s1 + $0xa8] sm:$0xff]  }
  0x2c   : > { %444 = vmatprep.mubr.bf16.mxu1 %v2194_v4 }
  0x2d   : > { %643 = vrot.lane.b32.xlu0 %v250_v10, %s2197_s10 }
  0x2f   : > { %784 = vrot.lane.b32.xlu1 %v243_v8, %s2198_s13 }
  0x31   : > { %786 = vrot.lane.b32.xlu0 %v251_v11, %s2198_s13 }
  0x33   : > { %788 = vrot.lane.b32.xlu1 %v250_v10, %s2198_s13  ;;  %1899 = vmatmul.mubr.msk.bf16.gmra.mxu1 %vm261_vm1, %v2102_v15  ;;  %v2111_v15 = vld [vmem:[%s3154_s1 + $0x58] sm:$0xff]  }
  0x34   : > { %454 = vmatprep.mubr.bf16.mxu1 %v2194_v4 }
  0x35   : > { %929 = vrot.lane.b32.xlu0 %v243_v8, %s2199_s22 }
  0x37   : > { %931 = vrot.lane.b32.xlu1 %v251_v11, %s2199_s22 }
  0x39   : > { %933 = vrot.lane.b32.xlu0 %v250_v10, %s2199_s22 }
  0x3b   : > { %1074 = vrot.lane.b32.xlu1 %v243_v8, %s2200_s28  ;;  %1900 = vmatmul.mubr.msk.bf16.gmra.mxu1 %vm261_vm1, %v2104_v16  ;;  %v2118_v16 = vld [vmem:[%s3154_s1 + $0xb0] sm:$0xff]  }
  0x3c   : > { %698 = vmatprep.mubr.bf16.mxu1 %v2194_v4 }
  0x3d   : > { %1076 = vrot.lane.b32.xlu0 %v251_v11, %s2200_s28 }
  0x3f   : > { %1078 = vrot.lane.b32.xlu1 %v250_v10, %s2200_s28 }
  0x41   : > { %1219 = vrot.lane.b32.xlu0 %v243_v8, %s2201_s29  ;;  %v2112_v8 = vld [vmem:[%s3154_s1 + $0x78] sm:$0xff]  }
  0x43   : > { %1221 = vrot.lane.b32.xlu1 %v251_v11, %s2201_s29  ;;  %v2114_v11 = vld [vmem:[%s3154_s1 + $0xa0] sm:$0xff]  }
  0x45   : > { %1223 = vrot.lane.b32.xlu0 %v250_v10, %s2201_s29 }
  0x47   : > { %1345 = vperm.xlu1 %2094, %v1335_v19   ;;  %v2113_v19 = vld [vmem:[%s3154_s1 + $0x80] sm:$0xff]  }
  0x49   : > { %1350 = vperm.xlu0 %2095, %v1336_v20  }
  0x4b   : > { %1355 = vperm.xlu1 %2094, %v1337_v22   ;;  %v2115_v22 = vld [vmem:[%s3154_s1 + $0x88] sm:$0xff]  }
  0x4d   : > { %1365 = vperm.xlu0 %2095, %v1339_v25   ;;  %v2124_v25 = vld [vmem:[%s3154_s1 + $0xe8] sm:$0xff]  }
  0x4f   : > { %1360 = vperm.xlu1 %2094, %v1338_v30   ;;  %v2123_v30 = vld [vmem:[%s3154_s1 + $0xc8] sm:$0xff]  }
  0x53   : > { %1370 = vperm.xlu1 %2094, %v1340_v33  }
  0x57   : > { %1380 = vperm.xlu1 %2094, %v1342_v43  }
  0x8f   : > { %v253_v17 = vpop.permute.xlu0 %252 }
  0x91   : > { %v257_v18 = vpop.permute.xlu1 %256 }
  0x93   : > { %v255_v21 = vpop.permute.xlu0 %254 }
  0x94   : > { %v260_v23 = vsel %vm258_vm2, %v255_v21, %v257_v18  ;;  %v259_v24 = vsel %vm258_vm2, %v253_v17, %v255_v21  ;;  %v1341_v17 = vld [vmem:[%s3155_s2 + $0x30] sm:$0xff]  ;;  %v2120_v21 = vld [vmem:[%s3154_s1 + $0xb8] sm:$0xff]  }
  0x95   : > { %1887 = vmatprep.subr.msk.bf16.mxu0 %vm274_vm0, %v260_v23  ;;  %v495_v26 = vpop.permute.xlu1 %494  ;;  %v276_v27 = vsel %vm274_vm0, %v259_v24, 0  ;;  %1375 = vperm.xlu0 %2095, %v1341_v17   ;;  %v2122_v23 = vld [vmem:[%s3154_s1 + $0xe0] sm:$0xff]   ;;  %v2117_v24 = vld [vmem:[%s3154_s1 + $0x90] sm:$0xff]  }
  0x96   : > { %296 = vmatpush1.bf16.msra.mxu0 %v276_v27  ;;  %v2126_v27 = vld [vmem:[%s3154_s1 + $0xf0] sm:$0xff]  }
  0x97   : > { %v640_v29 = vpop.permute.xlu0 %639 }
  0x99   : > { %1888 = vmatmul.mubr.msk.bf16.vlgmr.msra.gmra.mxu0 %vm261_vm1, %v2097_v28  ;;  %v499_v31 = vpop.permute.xlu1 %498  ;;  %v2121_v28 = vld [vmem:[%s3154_s1 + $0xc0] sm:$0xff]  }
  0x9a   : > { %323 = vmatprep.mubr.bf16.mxu0 %v2194_v4 }
  0x9b   : > { %v497_v32 = vpop.permute.xlu0 %496 }
  0x9c   : > { %v501_v34 = vsel %vm500_vm3, %v495_v26, %v497_v32  ;;  %v502_v35 = vsel %vm500_vm3, %v497_v32, %v499_v31  ;;  %v2119_v26 = vld [vmem:[%s3154_s1 + $0x98] sm:$0xff]   ;;  %v2125_v31 = vld [vmem:[%s3154_s1 + $0xd0] sm:$0xff]  }
  0x9d   : > { %v516_v36 = vsel %vm274_vm0, %v501_v34, 0  ;;  %1913 = vmatprep.subr.msk.bf16.mxu0 %vm274_vm0, %v502_v35  ;;  %v642_v37 = vpop.permute.xlu1 %641  ;;  %v2127_v32 = vld [vmem:[%s3154_s1 + $0xd8] sm:$0xff]  }
  0x9e   : > { %v646_v39 = vsel %vm645_vm4, %v640_v29, %v642_v37  ;;  %536 = vmatpush1.bf16.msra.mxu0 %v516_v36  ;;  %v2128_v29 = vld [vmem:[%s3154_s1 + $0xf8] sm:$0xff]  }
  0x9f   : > { %v661_v40 = vsel %vm274_vm0, %v646_v39, 0  ;;  %v644_v41 = vpop.permute.xlu0 %643 }
  0xa0   : > { %v647_v42 = vsel %vm645_vm4, %v642_v37, %v644_v41 }
  0xa1   : > { %1889 = vmatmul.mubr.msk.bf16.gmra.mxu0 %vm261_vm1, %v2099_v38  ;;  %1930 = vmatprep.subr.msk.bf16.mxu1 %vm274_vm0, %v647_v42  ;;  %v785_v44 = vpop.permute.xlu1 %784 }
  0xa2   : > { %681 = vmatpush1.bf16.msra.mxu1 %v661_v40  ;;  %333 = vmatprep.mubr.bf16.mxu0 %v2194_v4 }
  0xa3   : > { %v787_v46 = vpop.permute.xlu0 %786 }
  0xa4   : > { %v791_v63 = vsel %vm790_vm5, %v785_v44, %v787_v46 }
  0xa5   : > { %v789_v48 = vpop.permute.xlu1 %788  ;;  %1931 = vmatmul.mubr.msk.bf16.vlgmr.msra.gmra.mxu1 %vm261_vm1, %v2106_v45  ;;  %v806_v2 = vsel %vm274_vm0, %v791_v63, 0 }
  0xa6   : > { %v792_v49 = vsel %vm790_vm5, %v787_v46, %v789_v48  ;;  %708 = vmatprep.mubr.bf16.mxu1 %v2194_v4 }
  0xa7   : > { %v930_v50 = vpop.permute.xlu0 %929  ;;  %1947 = vmatprep.subr.msk.bf16.mxu0 %vm274_vm0, %v792_v49 }
  0xa9   : > { %1890 = vmatmul.mubr.msk.bf16.gmra.mxu0 %vm261_vm1, %v2101_v47  ;;  %v932_v51 = vpop.permute.xlu1 %931 }
  0xaa   : > { %343 = vmatprep.mubr.bf16.mxu0 %v2194_v4  ;;  %v936_v53 = vsel %vm935_vm6, %v930_v50, %v932_v51 }
  0xab   : > { %v934_v54 = vpop.permute.xlu0 %933  ;;  %v951_v55 = vsel %vm274_vm0, %v936_v53, 0 }
  0xac   : > { %v937_v56 = vsel %vm935_vm6, %v932_v51, %v934_v54 }
  0xad   : > { %1964 = vmatprep.subr.msk.bf16.mxu1 %vm274_vm0, %v937_v56  ;;  %1932 = vmatmul.mubr.msk.bf16.gmra.mxu1 %vm261_vm1, %v2108_v52  ;;  %v1075_v58 = vpop.permute.xlu1 %1074 }
  0xae   : > { %971 = vmatpush1.bf16.msra.mxu1 %v951_v55  ;;  %718 = vmatprep.mubr.bf16.mxu1 %v2194_v4 }
  0xaf   : > { %v1077_v59 = vpop.permute.xlu0 %1076 }
  0xb0   : > { %v1081_v18 = vsel %vm1080_vm7, %v1075_v58, %v1077_v59 }
  0xb1   : > { %1891 = vmatmul.mubr.msk.bf16.gmra.mxu0 %vm261_vm1, %v2103_v57  ;;  %v1079_v61 = vpop.permute.xlu1 %1078  ;;  %v1096_v20 = vsel %vm274_vm0, %v1081_v18, 0 }
  0xb2   : > { %553 = vmatprep.mubr.bf16.mxu0 %v2194_v4  ;;  %v1082_v6 = vsel %vm1080_vm7, %v1077_v59, %v1079_v61 }
  0xb3   : > { %v1220_v62 = vpop.permute.xlu0 %1219 }
  0xb5   : > { %1933 = vmatmul.mubr.msk.bf16.gmra.mxu1 %vm261_vm1, %v2110_v60  ;;  %v1222_v1 = vpop.permute.xlu1 %1221 }
  0xb6   : > { %728 = vmatprep.mubr.bf16.mxu1 %v2194_v4  ;;  %v1226_v10 = vsel %vm1225_vm8, %v1220_v62, %v1222_v1 }
  0xb7   : > { %v1224_v5 = vpop.permute.xlu0 %1223  ;;  %v1241_v12 = vsel %vm274_vm0, %v1226_v10, 0 }
  0xb8   : > { %v1227_v7 = vsel %vm1225_vm8, %v1222_v1, %v1224_v5 }
  0xb9   : > { %1914 = vmatmul.mubr.msk.bf16.vlgmr.msra.gmra.mxu0 %vm261_vm1, %v2105_v0  ;;  %1998 = vmatprep.subr.msk.bf16.mxu1 %vm274_vm0, %v1227_v7 }
  0xba   : > { %826 = vmatpush1.bf16.msra.mxu0 %v806_v2  ;;  %563 = vmatprep.mubr.bf16.mxu0 %v2194_v4 }
  0xbb   : > { %1981 = vmatprep.subr.msk.bf16.mxu0 %vm274_vm0, %v1082_v6 }
  0xbd   : > { %1934 = vmatmul.mubr.msk.bf16.gmra.mxu1 %vm261_vm1, %v2112_v8 }
  0xbe   : > { %988 = vmatprep.mubr.bf16.mxu1 %v2194_v4 }
  0xc1   : > { %1915 = vmatmul.mubr.msk.bf16.gmra.mxu0 %vm261_vm1, %v2107_v9 }
  0xc2   : > { %573 = vmatprep.mubr.bf16.mxu0 %v2194_v4 }
  0xc5   : > { %1965 = vmatmul.mubr.msk.bf16.vlgmr.msra.gmra.mxu1 %vm261_vm1, %v2114_v11 }
  0xc6   : > { %1261 = vmatpush1.bf16.msra.mxu1 %v1241_v12  ;;  %998 = vmatprep.mubr.bf16.mxu1 %v2194_v4 }
  0xc9   : > { %1916 = vmatmul.mubr.msk.bf16.gmra.mxu0 %vm261_vm1, %v2109_v13 }
  0xca   : > { %583 = vmatprep.mubr.bf16.mxu0 %v2194_v4 }
  0xcd   : > { %1966 = vmatmul.mubr.msk.bf16.gmra.mxu1 %vm261_vm1, %v2116_v14 }
  0xce   : > { %1008 = vmatprep.mubr.bf16.mxu1 %v2194_v4 }
  0xd1   : > { %1917 = vmatmul.mubr.msk.bf16.gmra.mxu0 %vm261_vm1, %v2111_v15 }
  0xd2   : > { %843 = vmatprep.mubr.bf16.mxu0 %v2194_v4 }
  0xd5   : > { %1967 = vmatmul.mubr.msk.bf16.gmra.mxu1 %vm261_vm1, %v2118_v16 }
  0xd6   : > { %1018 = vmatprep.mubr.bf16.mxu1 %v2194_v4 }
  0xd9   : > { %1948 = vmatmul.mubr.msk.bf16.vlgmr.msra.gmra.mxu0 %vm261_vm1, %v2113_v19 }
  0xda   : > { %1116 = vmatpush1.bf16.msra.mxu0 %v1096_v20  ;;  %853 = vmatprep.mubr.bf16.mxu0 %v2194_v4 }
  0xdd   : > { %1968 = vmatmul.mubr.msk.bf16.gmra.mxu1 %vm261_vm1, %v2120_v21 }
  0xde   : > { %1278 = vmatprep.mubr.bf16.mxu1 %v2194_v4 }
  0xe1   : > { %1949 = vmatmul.mubr.msk.bf16.gmra.mxu0 %vm261_vm1, %v2115_v22 }
  0xe2   : > { %863 = vmatprep.mubr.bf16.mxu0 %v2194_v4 }
  0xe3   : > { %v2494_v33 = vpop.f32.mrf.mxu1 }
  0xe5   : > { %1999 = vmatmul.mubr.msk.bf16.vlgmr.msra.gmra.mxu1 %vm261_vm1, %v2122_v23  ;;  %v2496_v34 = vpop.f32.mrf.mxu1 }
  0xe6   : > { %1288 = vmatprep.mubr.bf16.mxu1 %v2194_v4 }
  0xe7   : > { %v2498_v35 = vpop.f32.mrf.mxu1 }
  0xe9   : > { %1950 = vmatmul.mubr.msk.bf16.gmra.mxu0 %vm261_vm1, %v2117_v24  ;;  %v2500_v36 = vpop.f32.mrf.mxu1 }
  0xea   : > { %873 = vmatprep.mubr.bf16.mxu0 %v2194_v4 }
  0xeb   : > { %v2502_v37 = vpop.f32.mrf.mxu1 }
  0xed   : > { %2000 = vmatmul.mubr.msk.bf16.gmra.mxu1 %vm261_vm1, %v2124_v25  ;;  %v2504_v38 = vpop.f32.mrf.mxu1 }
  0xee   : > { %1298 = vmatprep.mubr.bf16.mxu1 %v2194_v4 }
  0xef   : > { %v2506_v39 = vpop.f32.mrf.mxu1 }
  0xf1   : > { %1951 = vmatmul.mubr.msk.bf16.gmra.mxu0 %vm261_vm1, %v2119_v26 }
  0xf2   : > { %1133 = vmatprep.mubr.bf16.mxu0 %v2194_v4 }
  0xf5   : > { %2001 = vmatmul.mubr.msk.bf16.gmra.mxu1 %vm261_vm1, %v2126_v27 }
  0xf6   : > { %1308 = vmatprep.mubr.bf16.mxu1 %v2194_v4 }
  0xf9   : > { %1982 = vmatmul.mubr.msk.bf16.vlgmr.msra.gmra.mxu0 %vm261_vm1, %v2121_v28 }
  0xfa   : > { %1143 = vmatprep.mubr.bf16.mxu0 %v2194_v4 }
  0xfd   : > { %2002 = vmatmul.mubr.msk.bf16.gmra.mxu1 %vm261_vm1, %v2128_v29 }
 0x101   : > { %1983 = vmatmul.mubr.msk.bf16.gmra.mxu0 %vm261_vm1, %v2123_v30 }
 0x102   : > { %1153 = vmatprep.mubr.bf16.mxu0 %v2194_v4 }
 0x109   : > { %1984 = vmatmul.mubr.msk.bf16.gmra.mxu0 %vm261_vm1, %v2125_v31 }
 0x10a   : > { %1163 = vmatprep.mubr.bf16.mxu0 %v2194_v4  ;;  %v2508_v4 = vpop.f32.mrf.mxu1 }
 0x10c   : > { %v2510_v40 = vpop.f32.mrf.mxu1 }
 0x10e   : > { %v2512_v41 = vpop.f32.mrf.mxu1 }
 0x110   : > { %v2514_v42 = vpop.f32.mrf.mxu1 }
 0x111   : > { %1985 = vmatmul.mubr.msk.bf16.gmra.mxu0 %vm261_vm1, %v2127_v32 }
 0x112   : > { %v2516_v43 = vpop.f32.mrf.mxu1 }
 0x114   : > { %v2518_v44 = vpop.f32.mrf.mxu1 }
 0x116   : > { %v2522_v46 = vpop.f32.mrf.mxu1 }
 0x118   : > { %v2528_v49 = vpop.f32.mrf.mxu1 }
 0x119   : > { %3161 = vst [vmem:[#allocation5_spill] sm:$0xff] %v2528_v49 }
 0x11a   : > { %v462_v52 = vpop.f32.mrf.mxu1 }
 0x159   : > { %v2520_v45 = vpop.f32.mrf.mxu0 }
 0x15b   : > { %v2524_v47 = vpop.f32.mrf.mxu0 }
 0x15d   : > { %v2526_v48 = vpop.f32.mrf.mxu0 }
 0x15f   : > { %v2530_v50 = vpop.f32.mrf.mxu0 }
 0x161   : > { %v2532_v51 = vpop.f32.mrf.mxu0 }
 0x163   : > { %v2534_v53 = vpop.f32.mrf.mxu0 }
 0x165   : > { %v2536_v54 = vpop.f32.mrf.mxu0  ;;  %v2538_v55 = vpop.f32.mrf.mxu1 }
 0x167   : > { %v2540_v56 = vpop.f32.mrf.mxu0  ;;  %v2542_v57 = vpop.f32.mrf.mxu1 }
 0x169   : > { %v2544_v58 = vpop.f32.mrf.mxu0  ;;  %v2546_v59 = vpop.f32.mrf.mxu1 }
 0x16b   : > { %v2548_v60 = vpop.f32.mrf.mxu0  ;;  %v2550_v61 = vpop.f32.mrf.mxu1 }
 0x16d   : > { %v2552_v62 = vpop.f32.mrf.mxu0  ;;  %v2554_v63 = vpop.f32.mrf.mxu1 }
 0x16f   : > { %v2556_v0 = vpop.f32.mrf.mxu0  ;;  %v2558_v1 = vpop.f32.mrf.mxu1 }
 0x171   : > { %v2560_v2 = vpop.f32.mrf.mxu0  ;;  %v2562_v5 = vpop.f32.mrf.mxu1 }
 0x172   : > { %3162 = vst [vmem:[#allocation6_spill] sm:$0xff] %v2562_v5 }
 0x173   : > { %v2564_v6 = vpop.f32.mrf.mxu0  ;;  %v2566_v7 = vpop.f32.mrf.mxu1 }
 0x174   : > { %3163 = vst [vmem:[#allocation7_spill] sm:$0xff] %v2566_v7 }
 0x175   : > { %v2568_v8 = vpop.f32.mrf.mxu0  ;;  %v2570_v9 = vpop.f32.mrf.mxu1 }
 0x176   : > { %3164 = vst [vmem:[#allocation8_spill] sm:$0xff] %v2568_v8  ;;  %3165 = vst [vmem:[#allocation9_spill] sm:$0xff] %v2570_v9 }
 0x177   : > { %v351_v10 = vpop.f32.mrf.mxu0  ;;  %v2572_v11 = vpop.f32.mrf.mxu1 }
 0x178   : > { %3166 = vst [vmem:[#allocation10_spill] sm:$0xff] %v2572_v11  ;;  %v2574_v12 = vadd.f32 %v462_v52, %v351_v10 }
 0x179   : > { %v555_v13 = vpop.f32.mrf.mxu0  ;;  %v2576_v14 = vpop.f32.mrf.mxu1 }
 0x17a   : > { %3167 = vst [vmem:[#allocation11_spill] sm:$0xff] %v2574_v12  ;;  %3168 = vst [vmem:[#allocation12_spill] sm:$0xff] %v2576_v14 }
 0x17b   : > { %v2578_v15 = vpop.f32.mrf.mxu0  ;;  %v2580_v16 = vpop.f32.mrf.mxu1 }
 0x17c   : > { %3169 = vst [vmem:[#allocation13_spill] sm:$0xff] %v2580_v16 }
 0x17d   : > { %v2582_v17 = vpop.f32.mrf.mxu0  ;;  %v2584_v18 = vpop.f32.mrf.mxu1 }
 0x17e   : > { %3170 = vst [vmem:[#allocation14_spill] sm:$0xff] %v2584_v18 }
 0x17f   : > { %v2586_v19 = vpop.f32.mrf.mxu0  ;;  %v2588_v20 = vpop.f32.mrf.mxu1 }
 0x180   : > { %3171 = vst [vmem:[#allocation15_spill] sm:$0xff] %v2588_v20 }
 0x181   : > { %v2590_v21 = vpop.f32.mrf.mxu0  ;;  %v2592_v22 = vpop.f32.mrf.mxu1 }
 0x182   : > { %3172 = vst [vmem:[#allocation16_spill] sm:$0xff] %v2592_v22 }
 0x183   : > { %v2594_v23 = vpop.f32.mrf.mxu0  ;;  %v2596_v24 = vpop.f32.mrf.mxu1 }
 0x184   : > { %3173 = vst [vmem:[#allocation17_spill] sm:$0xff] %v2596_v24 }
 0x185   : > { %v2598_v25 = vpop.f32.mrf.mxu0  ;;  %v2600_v26 = vpop.f32.mrf.mxu1 }
 0x187   : > { %v2602_v27 = vpop.f32.mrf.mxu0  ;;  %v2604_v28 = vpop.f32.mrf.mxu1 }
 0x189   : > { %v2606_v29 = vpop.f32.mrf.mxu0  ;;  %v2608_v30 = vpop.f32.mrf.mxu1 }
 0x18b   : > { %v2610_v31 = vpop.f32.mrf.mxu0  ;;  %v2612_v32 = vpop.f32.mrf.mxu1 }
 0x18c   : > { %3174 = vst [vmem:[#allocation18_spill] sm:$0xff] %v2612_v32 }
 0x18d   : > { %v2614_v52 = vpop.f32.mrf.mxu0  ;;  %v2616_v10 = vpop.f32.mrf.mxu1 }
 0x18e   : > { %3175 = vst [vmem:[#allocation19_spill] sm:$0xff] %v2614_v52  ;;  %3176 = vst [vmem:[#allocation20_spill] sm:$0xff] %v2616_v10 }
 0x18f   : > { %v2618_v24 = vpop.f32.mrf.mxu0  ;;  %v2620_v22 = vpop.f32.mrf.mxu1 }
 0x190   : > { %3177 = vst [vmem:[#allocation21_spill] sm:$0xff] %v2618_v24  ;;  %3178 = vst [vmem:[#allocation22_spill] sm:$0xff] %v2620_v22 }
 0x191   : > { %v2622_v12 = vpop.f32.mrf.mxu0  ;;  %v2624_v20 = vpop.f32.mrf.mxu1 }
 0x192   : > { %3179 = vst [vmem:[#allocation23_spill] sm:$0xff] %v2622_v12  ;;  %3180 = vst [vmem:[#allocation24_spill] sm:$0xff] %v2624_v20 }
 0x193   : > { %v2626_v18 = vpop.f32.mrf.mxu0  ;;  %v2628_v16 = vpop.f32.mrf.mxu1 }
 0x194   : > { %3181 = vst [vmem:[#allocation25_spill] sm:$0xff] %v2626_v18  ;;  %3182 = vst [vmem:[#allocation26_spill] sm:$0xff] %v2628_v16 }
 0x195   : > { %v2630_v14 = vpop.f32.mrf.mxu0  ;;  %v2632_v11 = vpop.f32.mrf.mxu1 }
 0x196   : > { %3183 = vst [vmem:[#allocation27_spill] sm:$0xff] %v2630_v14  ;;  %3184 = vst [vmem:[#allocation28_spill] sm:$0xff] %v2632_v11 }
 0x197   : > { %v2634_v9 = vpop.f32.mrf.mxu0  ;;  %v2636_v52 = vpop.f32.mrf.mxu1 }
 0x198   : > { %3185 = vst [vmem:[#allocation29_spill] sm:$0xff] %v2634_v9  ;;  %3186 = vst [vmem:[#allocation30_spill] sm:$0xff] %v2636_v52 }
 0x199   : > { %v845_v10 = vpop.f32.mrf.mxu0  ;;  %v2638_v24 = vpop.f32.mrf.mxu1 }
 0x19a   : > { %3187 = vst [vmem:[#allocation31_spill] sm:$0xff] %v2638_v24 }
 0x19b   : > { %v847_v22 = vpop.f32.mrf.mxu0  ;;  %v2640_v32 = vpop.f32.mrf.mxu1 }
 0x19c   : > { %3188 = vst [vmem:[#allocation32_spill] sm:$0xff] %v2640_v32 }
 0x19d   : > { %v2642_v12 = vpop.f32.mrf.mxu0  ;;  %v2644_v20 = vpop.f32.mrf.mxu1 }
 0x19e   : > { %3189 = vst [vmem:[#allocation33_spill] sm:$0xff] %v2644_v20 }
 0x19f   : > { %v2646_v18 = vpop.f32.mrf.mxu0  ;;  %v2648_v16 = vpop.f32.mrf.mxu1 }
 0x1a0   : > { %3190 = vst [vmem:[#allocation34_spill] sm:$0xff] %v2648_v16 }
 0x1a1   : > { %v2650_v14 = vpop.f32.mrf.mxu0  ;;  %v2652_v11 = vpop.f32.mrf.mxu1 }
 0x1a2   : > { %3191 = vst [vmem:[#allocation35_spill] sm:$0xff] %v2650_v14  ;;  %3192 = vst [vmem:[#allocation36_spill] sm:$0xff] %v2652_v11  ;;  %v427_v11 = vadd.f32 %v2494_v33, %v2520_v45  ;;  %v2692_v33 = vld [vmem:[%s3156_s3 + $0x8] sm:$0xff] }
 0x1a3   : > { %v2654_v9 = vpop.f32.mrf.mxu0  ;;  %v2656_v52 = vpop.f32.mrf.mxu1 }
 0x1a4   : > { %3193 = vst [vmem:[#allocation37_spill] sm:$0xff] %v2654_v9  ;;  %3194 = vst [vmem:[#allocation38_spill] sm:$0xff] %v2656_v52  ;;  %v1403_v52 = vsub.s32 0, %v2280_v3 }
 0x1a5   : > { %v2658_v24 = vpop.f32.mrf.mxu0  ;;  %v2660_v7 = vpop.f32.mrf.mxu1 }
 0x1a6   : > { %3195 = vst [vmem:[#allocation39_spill] sm:$0xff] %v2658_v24  ;;  %3196 = vst [vmem:[#allocation40_spill] sm:$0xff] %v2660_v7 }
 0x1a7   : > { %v2662_v32 = vpop.f32.mrf.mxu0  ;;  %v2664_v5 = vpop.f32.mrf.mxu1 }
 0x1a8   : > { %3197 = vst [vmem:[#allocation41_spill] sm:$0xff] %v2662_v32  ;;  %3198 = vst [vmem:[#allocation42_spill] sm:$0xff] %v2664_v5  ;;  %v2684_v32 = vld [vmem:[%s3156_s3] sm:$0xff] }
 0x1a9   : > { %v2666_v20 = vpop.f32.mrf.mxu0  ;;  %v2668_v49 = vpop.f32.mrf.mxu1  ;;  %v2702_v7 = vrot.slane %v2684_v32, %v1403_v52 }
 0x1aa   : > { %3199 = vst [vmem:[#allocation43_spill] sm:$0xff] %v2666_v20  ;;  %3200 = vst [vmem:[#allocation44_spill] sm:$0xff] %v2668_v49  ;;  %v1424_v20 = vsub.s32 1, %v2280_v3  ;;  %v431_v49 = vadd.f32 %v2498_v35, %v2526_v48  ;;  %v433_v35 = vadd.f32 %v2500_v36, %v2530_v50 }
 0x1ab   : > { %v2670_v16 = vpop.f32.mrf.mxu0  ;;  %v2672_v8 = vpop.f32.mrf.mxu1 }
 0x1ac   : > { %3201 = vst [vmem:[#allocation45_spill] sm:$0xff] %v2670_v16  ;;  %3202 = vst [vmem:[#allocation46_spill] sm:$0xff] %v2672_v8  ;;  %v429_v16 = vadd.f32 %v2496_v34, %v2524_v47  ;;  %v594_v8 = vadd.f32 %v555_v13, %v427_v11  ;;  %v2709_v11 = vrot.slane %v2692_v33, %v1403_v52 }
 0x1ad   : > { %v2677_v24 = vpop.f32.mrf.mxu0  ;;  %v2679_v9 = vpop.f32.mrf.mxu1  ;;  %v2712_v13 = vrot.slane %v2684_v32, %v1424_v20 }
 0x1ae   : > { %3203 = vst [vmem:[#allocation47_spill] sm:$0xff] %v2677_v24  ;;  %3204 = vst [vmem:[#allocation48_spill] sm:$0xff] %v2679_v9  ;;  %v1445_v24 = vsub.s32 2, %v2280_v3  ;;  %v1466_v9 = vsub.s32 3, %v2280_v3  ;;  %v595_v5 = vadd.f32 %v2578_v15, %v429_v16  ;;  %v739_v48 = vadd.f32 %v2538_v55, %v594_v8 }
 0x1af   : > { %v2694_v45 = vpop.f32.mrf.mxu0  ;;  %v2706_v47 = vpop.f32.mrf.mxu1  ;;  %v596_v15 = vadd.f32 %v2582_v17, %v431_v49  ;;  %v2721_v16 = vrot.slane %v2692_v33, %v1424_v20  ;;  %v437_v49 = vadd.f32 %v2502_v37, %v2532_v51  ;;  %v597_v55 = vadd.f32 %v2586_v19, %v433_v35 }
 0x1b0   : > { %3205 = vst [vmem:[#allocation49_spill] sm:$0xff] %v2694_v45  ;;  %3207 = vst [vmem:[#allocation51_spill] sm:$0xff] %v2706_v47  ;;  %v1487_v45 = vsub.s32 4, %v2280_v3  ;;  %v2726_v52 = vrot.slane %v2684_v32, %v1445_v24  ;;  %v2729_v47 = vrot.slane %v2692_v33, %v1445_v24  ;;  %v2732_v14 = vrot.slane %v2684_v32, %v1466_v9 }
 0x1b1   : > { %v2704_v34 = vpop.f32.mrf.mxu0  ;;  %v2735_v36 = vrot.slane %v2692_v33, %v1466_v9  ;;  %v740_v50 = vadd.f32 %v2542_v57, %v595_v5  ;;  %v884_v8 = vadd.f32 %v845_v10, %v739_v48  ;;  %v439_v17 = vadd.f32 %v2504_v38, %v2534_v53  ;;  %v2745_v24 = vpop.f32.mrf.mxu1 }
 0x1b2   : > { %3206 = vst [vmem:[#allocation50_spill] sm:$0xff] %v2704_v34  ;;  %3208 = vst [vmem:[#allocation52_spill] sm:$0xff] %v2732_v14  ;;  %v2748_v14 = vrot.slane %v2684_v32, %v1487_v45  ;;  %v2751_v9 = vrot.slane %v2692_v33, %v1487_v45  ;;  %v3209_v37 = vsub.s32 5, %v2280_v3  ;;  %v441_v57 = vadd.f32 %v2506_v39, %v2536_v54 }
 0x1b3   : > { %v2723_v34 = vpop.f32.mrf.mxu0  ;;  %v741_v38 = vadd.f32 %v2546_v59, %v596_v15  ;;  %v598_v53 = vadd.f32 %v2590_v21, %v437_v49  ;;  %v885_v5 = vadd.f32 %v847_v22, %v740_v50  ;;  %v443_v19 = vadd.f32 %v2508_v4, %v2540_v56  ;;  %v1346_v15 = vpop.permute.xlu1 %1345  ;;  %v3213_v49 = vld [vmem:[#allocation5_spill] sm:$0xff] }
 0x1b4   : > { %v2756_v51 = vrot.slane %v2684_v32, %v3209_v37  ;;  %v447_v10 = vadd.f32 %v2510_v40, %v2544_v58  ;;  %v449_v45 = vadd.f32 %v2512_v41, %v2548_v60  ;;  %v599_v35 = vadd.f32 %v2594_v23, %v439_v17  ;;  %v2782_v60 = vpop.f32.mrf.mxu1  ;;  %v3217_v37 = vld [vmem:[#allocation18_spill] sm:$0xff] }
 0x1b5   : > { %v2743_v20 = vpop.f32.mrf.mxu0  ;;  %v451_v39 = vadd.f32 %v2514_v42, %v2552_v62  ;;  %v742_v54 = vadd.f32 %v2550_v61, %v597_v55  ;;  %v1029_v59 = vadd.f32 %v2600_v26, %v884_v8  ;;  %v886_v21 = vadd.f32 %v2642_v12, %v741_v38  ;;  %v3214_v55 = vld [vmem:[#allocation6_spill] sm:$0xff]  ;;  %v3216_v8 = vld [vmem:[#allocation37_spill] sm:$0xff] }
 0x1b6   : > { %v453_v4 = vadd.f32 %v2516_v43, %v2556_v0  ;;  %v457_v40 = vadd.f32 %v2518_v44, %v2560_v2  ;;  %v600_v41 = vadd.f32 %v2598_v25, %v441_v57  ;;  %v601_v56 = vadd.f32 %v2602_v27, %v443_v19  ;;  %v3210_v25 = vld [vmem:[#allocation35_spill] sm:$0xff]  ;;  %v3211_v27 = vld [vmem:[#allocation40_spill] sm:$0xff]  ;;  %v3218_v38 = vld [vmem:[#allocation42_spill] sm:$0xff] }
 0x1b7   : > { %v2769_v48 = vpop.f32.mrf.mxu0  ;;  %v743_v42 = vadd.f32 %v2554_v63, %v598_v53  ;;  %v1030_v61 = vadd.f32 %v2604_v28, %v885_v5  ;;  %v887_v62 = vadd.f32 %v2646_v18, %v742_v54  ;;  %v459_v43 = vadd.f32 %v2522_v46, %v2564_v6  ;;  %v3212_v18 = vld [vmem:[#allocation8_spill] sm:$0xff]  ;;  %v3215_v6 = vld [vmem:[#allocation7_spill] sm:$0xff]  ;;  %v3219_v19 = vld [vmem:[#allocation9_spill] sm:$0xff] }
 0x1b8   : > { %v744_v0 = vadd.f32 %v2558_v1, %v599_v35  ;;  %v602_v44 = vadd.f32 %v2606_v29, %v447_v10  ;;  %v603_v2 = vadd.f32 %v2610_v31, %v449_v45  ;;  %v1031_v23 = vadd.f32 %v2608_v30, %v886_v21  ;;  %v2800_v31 = vpop.f32.mrf.mxu1  ;;  %v3220_v45 = vld [vmem:[#allocation19_spill] sm:$0xff]  ;;  %v3221_v54 = vld [vmem:[#allocation10_spill] sm:$0xff] }
 0x1b9   : > { %v1135_v58 = vpop.f32.mrf.mxu0  ;;  %v888_v26 = vadd.f32 %v3210_v25, %v743_v42  ;;  %v461_v50 = vadd.f32 %v3213_v49, %v3212_v18  ;;  %v745_v46 = vadd.f32 %v3214_v55, %v600_v41  ;;  %v746_v1 = vadd.f32 %v3215_v6, %v601_v56  ;;  %v3222_v21 = vld [vmem:[#allocation39_spill] sm:$0xff]  ;;  %v3223_v42 = vld [vmem:[#allocation20_spill] sm:$0xff] }
 0x1ba   : > { %v1174_v12 = vadd.f32 %v1135_v58, %v1029_v59  ;;  %v889_v29 = vadd.f32 %v3216_v8, %v744_v0  ;;  %v1032_v30 = vadd.f32 %v3217_v37, %v887_v62  ;;  %v747_v10 = vadd.f32 %v3219_v19, %v602_v44  ;;  %v1351_v58 = vpop.permute.xlu0 %1350  ;;  %v3224_v0 = vld [vmem:[#allocation44_spill] sm:$0xff]  ;;  %v3227_v44 = vld [vmem:[#allocation41_spill] sm:$0xff]  ;;  %v2819_v18 = vpop.f32.mrf.mxu1 }
 0x1bb   : > { %v1137_v22 = vpop.f32.mrf.mxu0  ;;  %v604_v35 = vadd.f32 %v3220_v45, %v451_v39  ;;  %v748_v59 = vadd.f32 %v3221_v54, %v603_v2  ;;  %v890_v41 = vadd.f32 %v3222_v21, %v745_v46  ;;  %v1356_v46 = vpop.permute.xlu1 %1355  ;;  %v3233_v45 = vld [vmem:[#allocation48_spill] sm:$0xff] }
 0x1bc   : > { %v1175_v63 = vadd.f32 %v1137_v22, %v1030_v61  ;;  %v1319_v28 = vadd.f32 %v3211_v27, %v1174_v12  ;;  %v1033_v61 = vadd.f32 %v3223_v42, %v888_v26 }
 0x1bd   : > { %v1139_v17 = vpop.f32.mrf.mxu0 }
 0x1be   : > { %v1176_v57 = vadd.f32 %v1139_v17, %v1031_v23  ;;  %v1320_v53 = vadd.f32 %v3218_v38, %v1175_v63  ;;  %v2804_v5 = vadd.f32 %v1346_v15, %v1319_v28  ;;  %v3225_v23 = vld [vmem:[#allocation21_spill] sm:$0xff]  ;;  %v3226_v63 = vld [vmem:[#allocation22_spill] sm:$0xff]  ;;  %v891_v28 = vadd.f32 %v3227_v44, %v746_v1  ;;  %v3231_v1 = vld [vmem:[#allocation24_spill] sm:$0xff] }
 0x1bf   : > { %v1141_v56 = vpop.f32.mrf.mxu0  ;;  %v605_v25 = vadd.f32 %v3225_v23, %v453_v4  ;;  %v1034_v27 = vadd.f32 %v3226_v63, %v889_v29  ;;  %v3229_v4 = vld [vmem:[#allocation12_spill] sm:$0xff]  ;;  %v3230_v29 = vld [vmem:[#allocation23_spill] sm:$0xff]  ;;  %v1035_v37 = vadd.f32 %v3231_v1, %v890_v41  ;;  %v1304_v41 = vpop.f32.mrf.mxu1  ;;  %v3238_v44 = vld [vmem:[#allocation25_spill] sm:$0xff] }
 0x1c0   : > { %v2811_v12 = vadd.f32 %v1346_v15, %v1320_v53  ;;  %v1177_v62 = vadd.f32 %v1141_v56, %v1032_v30  ;;  %v1321_v22 = vadd.f32 %v3224_v0, %v1176_v57  ;;  %v1409_v2 = vmul.f32 %v2702_v7, %v2804_v5  ;;  %v3228_v15 = vld [vmem:[#allocation46_spill] sm:$0xff]  ;;  %v3232_v30 = vld [vmem:[#allocation43_spill] sm:$0xff]  ;;  %v3234_v56 = vld [vmem:[#allocation13_spill] sm:$0xff]  ;;  %v1361_v1 = vpop.permute.xlu1 %1360 }
 0x1c1   : > { %v1145_v39 = vpop.f32.mrf.mxu0  ;;  %v749_v8 = vadd.f32 %v3229_v4, %v604_v35  ;;  %v606_v17 = vadd.f32 %v3230_v29, %v457_v40  ;;  %v892_v57 = vadd.f32 %v3232_v30, %v747_v10  ;;  %v750_v42 = vadd.f32 %v3234_v56, %v605_v25  ;;  %v3236_v0 = vld [vmem:[#allocation45_spill] sm:$0xff]  ;;  %v3237_v10 = vld [vmem:[#allocation51_spill] sm:$0xff] }
 0x1c2   : > { %v2821_v49 = vadd.f32 %v1351_v58, %v1321_v22  ;;  %v1178_v26 = vadd.f32 %v1145_v39, %v1033_v61  ;;  %v1322_v55 = vadd.f32 %v3228_v15, %v1177_v62  ;;  %v1410_v6 = vmul.f32 %v2709_v11, %v2811_v12  ;;  %v3235_v61 = vld [vmem:[#allocation26_spill] sm:$0xff]  ;;  %v3242_v30 = vld [vmem:[#allocation27_spill] sm:$0xff] }
 0x1c3   : > { %v1147_v38 = vpop.f32.mrf.mxu0  ;;  %v1036_v62 = vadd.f32 %v3235_v61, %v891_v28  ;;  %v893_v22 = vadd.f32 %v3236_v0, %v748_v59  ;;  %v607_v25 = vadd.f32 %v3238_v44, %v459_v43  ;;  %v3239_v39 = vld [vmem:[#allocation14_spill] sm:$0xff]  ;;  %v3245_v61 = vld [vmem:[#allocation15_spill] sm:$0xff]  ;;  %v3247_v0 = vld [vmem:[#allocation29_spill] sm:$0xff]  ;;  %v1366_v44 = vpop.permute.xlu0 %1365 }
 0x1c4   : > { %v2830_v53 = vadd.f32 %v1351_v58, %v1322_v55  ;;  %v1179_v19 = vadd.f32 %v1147_v38, %v1034_v27  ;;  %v1323_v54 = vadd.f32 %v3233_v45, %v1178_v26  ;;  %v1411_v21 = vadd.f32 %v1410_v6, %v1409_v2  ;;  %v3240_v2 = vld [vmem:[#allocation28_spill] sm:$0xff]  ;;  %v3241_v26 = vld [vmem:[#allocation47_spill] sm:$0xff] }
 0x1c5   : > { %v1149_v35 = vpop.f32.mrf.mxu0  ;;  %v1430_v40 = vmul.f32 %v2712_v13, %v2821_v49  ;;  %v751_v28 = vadd.f32 %v3239_v39, %v606_v17  ;;  %v1037_v59 = vadd.f32 %v3240_v2, %v892_v57  ;;  %v894_v15 = vadd.f32 %v3241_v26, %v749_v8  ;;  %v1306_v57 = vpop.f32.mrf.mxu1  ;;  %v3250_v2 = vld [vmem:[#allocation16_spill] sm:$0xff] }
 0x1c6   : > { %v1180_v23 = vadd.f32 %v1149_v35, %v1035_v37  ;;  %v1324_v63 = vadd.f32 %v3237_v10, %v1179_v19  ;;  %v2839_v58 = vadd.f32 %v1356_v46, %v1323_v54  ;;  %1412 = vadd.xlane.f32.xlu0 %v1411_v21  ;;  %v1431_v27 = vmul.f32 %v2721_v16, %v2830_v53  ;;  %v3243_v19 = vld [vmem:[#allocation30_spill] sm:$0xff]  ;;  %v3244_v54 = vld [vmem:[#allocation49_spill] sm:$0xff]  ;;  %v3251_v26 = vld [vmem:[#allocation32_spill] sm:$0xff] }
 0x1c7   : > { %v1151_v55 = vpop.f32.mrf.mxu0  ;;  %v608_v38 = vadd.f32 %v3242_v30, %v461_v50  ;;  %v1038_v45 = vadd.f32 %v3243_v19, %v893_v22  ;;  %v895_v43 = vadd.f32 %v3244_v54, %v750_v42  ;;  %v752_v50 = vadd.f32 %v3245_v61, %v607_v25  ;;  %v3248_v42 = vld [vmem:[#allocation31_spill] sm:$0xff]  ;;  %v3253_v19 = vld [vmem:[#allocation17_spill] sm:$0xff] }
 0x1c8   : > { %v2847_v6 = vadd.f32 %v1356_v46, %v1324_v63  ;;  %v1181_v4 = vadd.f32 %v1151_v55, %v1036_v62  ;;  %v1325_v29 = vadd.f32 %v2745_v24, %v1180_v23  ;;  %v1432_v37 = vadd.f32 %v1431_v27, %v1430_v40  ;;  %v3246_v62 = vld [vmem:[#allocation11_spill] sm:$0xff]  ;;  %v3249_v40 = vld [vmem:[#allocation50_spill] sm:$0xff] }
 0x1c9   : > { %v1155_v21 = vpop.f32.mrf.mxu0  ;;  %v1451_v17 = vmul.f32 %v2726_v52, %v2839_v58  ;;  %v609_v22 = vadd.f32 %v3247_v0, %v3246_v62  ;;  %v1039_v35 = vadd.f32 %v3248_v42, %v894_v15  ;;  %v896_v23 = vadd.f32 %v3249_v40, %v751_v28 }
 0x1ca   : > { %v1182_v8 = vadd.f32 %v1155_v21, %v1037_v59  ;;  %v1326_v46 = vadd.f32 %v2782_v60, %v1181_v4  ;;  %v2856_v56 = vadd.f32 %v1361_v1, %v1325_v29  ;;  %1433 = vadd.xlane.f32.xlu1 %v1432_v37  ;;  %v1452_v24 = vmul.f32 %v2729_v47, %v2847_v6  ;;  %v3252_v29 = vld [vmem:[#allocation52_spill] sm:$0xff]  ;;  %v1310_v37 = vpop.f32.mrf.mxu1 }
 0x1cb   : > { %v1157_v10 = vpop.f32.mrf.mxu0  ;;  %v753_v59 = vadd.f32 %v3250_v2, %v608_v38  ;;  %v1040_v55 = vadd.f32 %v3251_v26, %v895_v43  ;;  %v897_v25 = vadd.f32 %v2723_v34, %v752_v50  ;;  %v754_v38 = vadd.f32 %v3253_v19, %v609_v22  ;;  %v1376_v26 = vpop.permute.xlu0 %1375 }
 0x1cc   : > { %v2865_v63 = vadd.f32 %v1361_v1, %v1326_v46  ;;  %v1183_v27 = vadd.f32 %v1157_v10, %v1038_v45  ;;  %v1327_v60 = vadd.f32 %v2800_v31, %v1182_v8  ;;  %v1453_v39 = vadd.f32 %v1452_v24, %v1451_v17  ;;  %v3254_v45 = vld [vmem:[#allocation33_spill] sm:$0xff]  ;;  %v1371_v8 = vpop.permute.xlu1 %1370  ;;  %v1312_v42 = vpop.f32.mrf.mxu1 }
 0x1cd   : > { %v1159_v4 = vpop.f32.mrf.mxu0  ;;  %v1472_v15 = vmul.f32 %v3252_v29, %v2856_v56  ;;  %v1041_v54 = vadd.f32 %v3254_v45, %v896_v23  ;;  %v898_v34 = vadd.f32 %v2743_v20, %v753_v59  ;;  %v1529_v21 = vsub.s32 6, %v2280_v3 }
 0x1ce   : > { %v2873_v28 = vadd.f32 %v1366_v44, %v1327_v60  ;;  %v1184_v1 = vadd.f32 %v1159_v4, %v1039_v35  ;;  %v1328_v30 = vadd.f32 %v2819_v18, %v1183_v27  ;;  %1454 = vadd.xlane.f32.xlu0 %v1453_v39  ;;  %v1473_v31 = vmul.f32 %v2735_v36, %v2865_v63  ;;  %v3255_v18 = vld [vmem:[#allocation34_spill] sm:$0xff]  ;;  %v3257_v27 = vld [vmem:[#allocation36_spill] sm:$0xff] }
 0x1cf   : > { %v1161_v43 = vpop.f32.mrf.mxu0  ;;  %v1042_v50 = vadd.f32 %v3255_v18, %v897_v25  ;;  %v899_v62 = vadd.f32 %v2769_v48, %v754_v38  ;;  %v3256_v20 = vsub.s32 5, %v2280_v3  ;;  %v1043_v48 = vadd.f32 %v3257_v27, %v898_v34  ;;  %v3258_v25 = vld [vmem:[#allocation38_spill] sm:$0xff] }
 0x1d0   : > { %v2882_v17 = vadd.f32 %v1366_v44, %v1328_v30  ;;  %v1185_v46 = vadd.f32 %v1161_v43, %v1040_v55  ;;  %v1329_v24 = vadd.f32 %v1304_v41, %v1184_v1  ;;  %v1474_v61 = vadd.f32 %v1473_v31, %v1472_v15 }
 0x1d1   : > { %v1165_v0 = vpop.f32.mrf.mxu0  ;;  %v1493_v22 = vmul.f32 %v2748_v14, %v2873_v28  ;;  %v2891_v35 = vrot.slane %v2692_v33, %v3256_v20  ;;  %v2899_v44 = vrot.slane %v2684_v32, %v1529_v21  ;;  %v1044_v4 = vadd.f32 %v3258_v25, %v899_v62 }
 0x1d2   : > { %v2893_v40 = vadd.f32 %v1371_v8, %v1329_v24  ;;  %v1186_v23 = vadd.f32 %v1165_v0, %v1041_v54  ;;  %v1330_v10 = vadd.f32 %v1306_v57, %v1185_v46  ;;  %1475 = vadd.xlane.f32.xlu0 %v1474_v61  ;;  %v1494_v41 = vmul.f32 %v2751_v9, %v2882_v17  ;;  %v1314_v57 = vpop.f32.mrf.mxu1  ;;  %v1381_v24 = vpop.permute.xlu1 %1380 }
 0x1d3   : > { %v1167_v60 = vpop.f32.mrf.mxu0  ;;  %v2907_v30 = vrot.slane %v2692_v33, %v1529_v21  ;;  %v1550_v31 = vsub.s32 7, %v2280_v3 }
 0x1d4   : > { %v2901_v39 = vadd.f32 %v1371_v8, %v1330_v10  ;;  %v1187_v2 = vadd.f32 %v1167_v60, %v1042_v50  ;;  %v1331_v59 = vadd.f32 %v1310_v37, %v1186_v23  ;;  %v1495_v55 = vadd.f32 %v1494_v41, %v1493_v22  ;;  %v1316_v61 = vpop.f32.mrf.mxu1 }
 0x1d5   : > { %v1169_v15 = vpop.f32.mrf.mxu0  ;;  %v1514_v1 = vmul.f32 %v2756_v51, %v2893_v40  ;;  %v2917_v21 = vrot.slane %v2684_v32, %v1550_v31  ;;  %v2920_v3 = vrot.slane %v2692_v33, %v1550_v31 }
 0x1d6   : > { %v2910_v19 = vadd.f32 %v1376_v26, %v1331_v59  ;;  %v1188_v38 = vadd.f32 %v1169_v15, %v1043_v48  ;;  %v1332_v45 = vadd.f32 %v1312_v42, %v1187_v2  ;;  %1496 = vadd.xlane.f32.xlu1 %v1495_v55  ;;  %v1515_v37 = vmul.f32 %v2891_v35, %v2901_v39 }
 0x1d7   : > { %v1171_v54 = vpop.f32.mrf.mxu0 }
 0x1d8   : > { %v2914_v34 = vadd.f32 %v1376_v26, %v1332_v45  ;;  %v1189_v43 = vadd.f32 %v1171_v54, %v1044_v4  ;;  %v1333_v8 = vadd.f32 %v1314_v57, %v1188_v38  ;;  %v1516_v46 = vadd.f32 %v1515_v37, %v1514_v1 }
 0x1d9   : > { %v1535_v62 = vmul.f32 %v2899_v44, %v2910_v19 }
 0x1da   : > { %v2922_v18 = vadd.f32 %v1381_v24, %v1333_v8  ;;  %v1334_v50 = vadd.f32 %v1316_v61, %v1189_v43  ;;  %1517 = vadd.xlane.f32.xlu0 %v1516_v46  ;;  %v1536_v0 = vmul.f32 %v2907_v30, %v2914_v34 }
 0x1dc   : > { %v2928_v42 = vadd.f32 %v1381_v24, %v1334_v50  ;;  %v1537_v22 = vadd.f32 %v1536_v0, %v1535_v62  ;;  %v1556_v32 = vmul.f32 %v2917_v21, %v2922_v18 }
 0x1de   : > { %1538 = vadd.xlane.f32.xlu1 %v1537_v22  ;;  %v1557_v33 = vmul.f32 %v2920_v3, %v2928_v42 }
 0x1e0   : > { %v1558_v20 = vadd.f32 %v1557_v33, %v1556_v32 }
 0x1e2   : > { %1559 = vadd.xlane.f32.xlu0 %v1558_v20 }
 0x24f   : > { %v1413_v23 = vpop.xlane.xlu0 %1412 }
 0x250   : > { %v1414_v10 = vrot.slane %v1413_v23, 4 }
 0x252   : > { %v1415_v41 = vadd.f32 %v1414_v10, %v1413_v23 }
 0x253   : > { %v1434_v27 = vpop.xlane.xlu1 %1433 }
 0x254   : > { %v1416_v48 = vrot.slane %v1415_v41, 2  ;;  %v1435_v60 = vrot.slane %v1434_v27, 4 }
 0x256   : > { %v1436_v2 = vadd.f32 %v1435_v60, %v1434_v27  ;;  %v1417_v59 = vadd.f32 %v1416_v48, %v1415_v41 }
 0x257   : > { %v1455_v26 = vpop.xlane.xlu0 %1454 }
 0x258   : > { %v1437_v55 = vrot.slane %v1436_v2, 2  ;;  %v1456_v25 = vrot.slane %v1455_v26, 4  ;;  %v1418_v4 = vrot.slane %v1417_v59, 1 }
 0x25a   : > { %v1457_v15 = vadd.f32 %v1456_v25, %v1455_v26  ;;  %v1419_v57 = vadd.f32 %v1418_v4, %v1417_v59  ;;  %v1438_v1 = vadd.f32 %v1437_v55, %v1436_v2 }
 0x25b   : > { %v1476_v31 = vpop.xlane.xlu0 %1475 }
 0x25c   : > { %v1458_v38 = vrot.slane %v1457_v15, 2  ;;  %v1477_v45 = vrot.slane %v1476_v31, 4  ;;  %2010 = vpush %v1419_v57  ;;  %v1439_v37 = vrot.slane %v1438_v1, 1 }
 0x25e   : > { %v1478_v54 = vadd.f32 %v1477_v45, %v1476_v31  ;;  %v1440_v43 = vadd.f32 %v1439_v37, %v1438_v1  ;;  %v1459_v8 = vadd.f32 %v1458_v38, %v1457_v15 }
 0x25f   : > { %v1497_v46 = vpop.xlane.xlu1 %1496 }
 0x260   : > { %v1479_v24 = vrot.slane %v1478_v54, 2  ;;  %v1498_v61 = vrot.slane %v1497_v46, 4  ;;  %2012 = vpush %v1440_v43  ;;  %v1460_v50 = vrot.slane %v1459_v8, 1 }
 0x262   : > { %v1499_v62 = vadd.f32 %v1498_v61, %v1497_v46  ;;  %v1461_v0 = vadd.f32 %v1460_v50, %v1459_v8  ;;  %v1480_v22 = vadd.f32 %v1479_v24, %v1478_v54 }
 0x263   : > { %v1518_v32 = vpop.xlane.xlu0 %1517 }
 0x264   : > { %v1500_v33 = vrot.slane %v1499_v62, 2  ;;  %v1519_v20 = vrot.slane %v1518_v32, 4  ;;  %2014 = vpush %v1461_v0  ;;  %v1481_v23 = vrot.slane %v1480_v22, 1 }
 0x266   : > { %v1520_v10 = vadd.f32 %v1519_v20, %v1518_v32  ;;  %v1482_v41 = vadd.f32 %v1481_v23, %v1480_v22  ;;  %v1501_v27 = vadd.f32 %v1500_v33, %v1499_v62 }
 0x267   : > { %v1539_v48 = vpop.xlane.xlu1 %1538 }
 0x268   : > { %v1521_v60 = vrot.slane %v1520_v10, 2  ;;  %v1540_v2 = vrot.slane %v1539_v48, 4  ;;  %2016 = vpush %v1482_v41  ;;  %v1502_v59 = vrot.slane %v1501_v27, 1 }
 0x26a   : > { %v1541_v26 = vadd.f32 %v1540_v2, %v1539_v48  ;;  %v1503_v55 = vadd.f32 %v1502_v59, %v1501_v27  ;;  %v1522_v25 = vadd.f32 %v1521_v60, %v1520_v10 }
 0x26b   : > { %v1560_v4 = vpop.xlane.xlu0 %1559 }
 0x26c   : > { %v1542_v15 = vrot.slane %v1541_v26, 2  ;;  %v1561_v57 = vrot.slane %v1560_v4, 4  ;;  %2018 = vpush %v1503_v55  ;;  %v1523_v1 = vrot.slane %v1522_v25, 1 }
 0x26e   : > { %v1562_v31 = vadd.f32 %v1561_v57, %v1560_v4  ;;  %v1524_v38 = vadd.f32 %v1523_v1, %v1522_v25  ;;  %v1543_v45 = vadd.f32 %v1542_v15, %v1541_v26 }
 0x270   : > { %v1563_v37 = vrot.slane %v1562_v31, 2  ;;  %2020 = vpush %v1524_v38  ;;  %v1544_v54 = vrot.slane %v1543_v45, 1 }
 0x272   : > { %v1545_v43 = vadd.f32 %v1544_v54, %v1543_v45  ;;  %v1564_v8 = vadd.f32 %v1563_v37, %v1562_v31 }
 0x274   : > { %2022 = vpush %v1545_v43  ;;  %v1565_v46 = vrot.slane %v1564_v8, 1 }
 0x276   : > { %v1566_v24 = vadd.f32 %v1565_v46, %v1564_v8 }
 0x278   : > { %2024 = vpush %v1566_v24 }
 0x28d   : > { %s2011_s12 = spop %2010 }
 0x291   : > { %s2013_s13 = spop %2012 }
 0x292   : > { %s1442_s20 = sadd.f32 %s2013_s13, %s2011_s12 }
 0x295   : > { %s2015_s14 = spop %2014 }
 0x296   : > { %s1463_s23 = sadd.f32 %s2015_s14, %s1442_s20 }
 0x299   : > { %s2017_s22 = spop %2016 }
 0x29a   : > { %s1484_s28 = sadd.f32 %s2017_s22, %s1463_s23 }
 0x29d   : > { %s2019_s27 = spop %2018 }
 0x29e   : > { %s1505_s30 = sadd.f32 %s2019_s27, %s1484_s28 }
 0x2a1   : > { %s2021_s29 = spop %2020 }
 0x2a2   : > { %s1526_s6 = sadd.f32 %s2021_s29, %s1505_s30 }
 0x2a5   : > { %s2023_s5 = spop %2022 }
 0x2a6   : > { %s1547_s7 = sadd.f32 %s2023_s5, %s1526_s6 }
 0x2a9   : > { %s2025_s8 = spop %2024 }
 0x2aa   : > { %s1568_s9 = sadd.f32 %s2025_s8, %s1547_s7 }
 0x2ac   : > { %s1569_s10 = smul.f32 0.00024414063, %s1568_s9 }
 0x2ae   : > { %v1570_v61 = vstv %s1569_s10 }
 0x2af   : > { %v2935_v50 = vsub.f32 %v2821_v49, %v1570_v61  ;;  %v2938_v62 = vsub.f32 %v2830_v53, %v1570_v61  ;;  %v2941_v0 = vsub.f32 %v2804_v5, %v1570_v61  ;;  %v2944_v22 = vsub.f32 %v2811_v12, %v1570_v61 }
 0x2b0   : > { %v2947_v32 = vsub.f32 %v2856_v56, %v1570_v61  ;;  %v2950_v33 = vsub.f32 %v2865_v63, %v1570_v61  ;;  %v2953_v20 = vsub.f32 %v2839_v58, %v1570_v61  ;;  %v2956_v49 = vsub.f32 %v2847_v6, %v1570_v61 }
 0x2b1   : > { %v1590_v53 = vmul.f32 %v2935_v50, %v2935_v50  ;;  %v1591_v5 = vmul.f32 %v2938_v62, %v2938_v62  ;;  %v1573_v12 = vmul.f32 %v2941_v0, %v2941_v0  ;;  %v1574_v56 = vmul.f32 %v2944_v22, %v2944_v22 }
 0x2b2   : > { %v1624_v63 = vmul.f32 %v2947_v32, %v2947_v32  ;;  %v1625_v58 = vmul.f32 %v2950_v33, %v2950_v33  ;;  %v1607_v6 = vmul.f32 %v2953_v20, %v2953_v20  ;;  %v1608_v23 = vmul.f32 %v2956_v49, %v2956_v49 }
 0x2b3   : > { %v1592_v10 = vmul.f32 %v1590_v53, %v2712_v13  ;;  %v1593_v41 = vmul.f32 %v1591_v5, %v2721_v16  ;;  %v1575_v27 = vmul.f32 %v1573_v12, %v2702_v7  ;;  %v1576_v48 = vmul.f32 %v1574_v56, %v2709_v11 }
 0x2b4   : > { %v1626_v60 = vmul.f32 %v1624_v63, %v3252_v29  ;;  %v1627_v2 = vmul.f32 %v1625_v58, %v2735_v36  ;;  %v1609_v59 = vmul.f32 %v1607_v6, %v2726_v52  ;;  %v1610_v26 = vmul.f32 %v1608_v23, %v2729_v47 }
 0x2b5   : > { %v1594_v55 = vadd.f32 %v1593_v41, %v1592_v10  ;;  %v1577_v25 = vadd.f32 %v1576_v48, %v1575_v27  ;;  %v2983_v4 = vsub.f32 %v2893_v40, %v1570_v61  ;;  %v2986_v13 = vsub.f32 %v2901_v39, %v1570_v61 }
 0x2b6   : > { %v1628_v16 = vadd.f32 %v1627_v2, %v1626_v60  ;;  %v1611_v7 = vadd.f32 %v1610_v26, %v1609_v59  ;;  %v2989_v11 = vsub.f32 %v2873_v28, %v1570_v61  ;;  %v2992_v29 = vsub.f32 %v2882_v17, %v1570_v61 }
 0x2b7   : > { %1595 = vadd.xlane.f32.xlu0 %v1594_v55  ;;  %1578 = vadd.xlane.f32.xlu1 %v1577_v25  ;;  %v1658_v47 = vmul.f32 %v2983_v4, %v2983_v4  ;;  %v1659_v52 = vmul.f32 %v2986_v13, %v2986_v13  ;;  %v2999_v36 = vsub.f32 %v2922_v18, %v1570_v61 }
 0x2b8   : > { %v1641_v40 = vmul.f32 %v2989_v11, %v2989_v11  ;;  %v1642_v28 = vmul.f32 %v2992_v29, %v2992_v29  ;;  %v3006_v17 = vsub.f32 %v2928_v42, %v1570_v61  ;;  %v3009_v39 = vsub.f32 %v2910_v19, %v1570_v61 }
 0x2b9   : > { %v1660_v15 = vmul.f32 %v1658_v47, %v2756_v51  ;;  %v1661_v57 = vmul.f32 %v1659_v52, %v2891_v35  ;;  %v1692_v18 = vmul.f32 %v2999_v36, %v2999_v36  ;;  %v3016_v1 = vsub.f32 %v2914_v34, %v1570_v61 }
 0x2ba   : > { %v1643_v31 = vmul.f32 %v1641_v40, %v2748_v14  ;;  %v1644_v38 = vmul.f32 %v1642_v28, %v2751_v9  ;;  %v1693_v42 = vmul.f32 %v3006_v17, %v3006_v17  ;;  %v1675_v19 = vmul.f32 %v3009_v39, %v3009_v39 }
 0x2bb   : > { %1629 = vadd.xlane.f32.xlu0 %v1628_v16  ;;  %1612 = vadd.xlane.f32.xlu1 %v1611_v7  ;;  %v1676_v51 = vmul.f32 %v3016_v1, %v3016_v1  ;;  %v1662_v35 = vadd.f32 %v1661_v57, %v1660_v15  ;;  %v1694_v45 = vmul.f32 %v1692_v18, %v2917_v21 }
 0x2bc   : > { %v1645_v34 = vadd.f32 %v1644_v38, %v1643_v31  ;;  %v1695_v37 = vmul.f32 %v1693_v42, %v2920_v3  ;;  %v1677_v14 = vmul.f32 %v1675_v19, %v2899_v44 }
 0x2bd   : > { %v1678_v9 = vmul.f32 %v1676_v51, %v2907_v30 }
 0x2be   : > { %v1696_v54 = vadd.f32 %v1695_v37, %v1694_v45 }
 0x2bf   : > { %1663 = vadd.xlane.f32.xlu0 %v1662_v35  ;;  %1646 = vadd.xlane.f32.xlu1 %v1645_v34  ;;  %v1679_v43 = vadd.f32 %v1678_v9, %v1677_v14 }
 0x2c3   : > { %1697 = vadd.xlane.f32.xlu0 %v1696_v54  ;;  %1680 = vadd.xlane.f32.xlu1 %v1679_v43 }
 0x340   : > { %v1596_v8 = vpop.xlane.xlu0 %1595  ;;  %v1579_v46 = vpop.xlane.xlu1 %1578 }
 0x341   : > { %v1597_v24 = vrot.slane %v1596_v8, 4  ;;  %v1580_v61 = vrot.slane %v1579_v46, 4 }
 0x343   : > { %v1598_v53 = vadd.f32 %v1597_v24, %v1596_v8  ;;  %v1581_v5 = vadd.f32 %v1580_v61, %v1579_v46 }
 0x344   : > { %v1630_v21 = vpop.xlane.xlu0 %1629  ;;  %v1613_v12 = vpop.xlane.xlu1 %1612 }
 0x345   : > { %v1599_v56 = vrot.slane %v1598_v53, 2  ;;  %v1582_v3 = vrot.slane %v1581_v5, 2  ;;  %v1631_v63 = vrot.slane %v1630_v21, 4  ;;  %v1614_v44 = vrot.slane %v1613_v12, 4 }
 0x347   : > { %v1632_v58 = vadd.f32 %v1631_v63, %v1630_v21  ;;  %v1615_v30 = vadd.f32 %v1614_v44, %v1613_v12  ;;  %v1583_v6 = vadd.f32 %v1582_v3, %v1581_v5  ;;  %v1600_v23 = vadd.f32 %v1599_v56, %v1598_v53 }
 0x348   : > { %v1664_v10 = vpop.xlane.xlu0 %1663  ;;  %v1647_v41 = vpop.xlane.xlu1 %1646 }
 0x349   : > { %v1633_v27 = vrot.slane %v1632_v58, 2  ;;  %v1616_v48 = vrot.slane %v1615_v30, 2  ;;  %v1665_v60 = vrot.slane %v1664_v10, 4  ;;  %v1648_v2 = vrot.slane %v1647_v41, 4 }
 0x34a   : > { %v1584_v59 = vrot.slane %v1583_v6, 1  ;;  %v1601_v26 = vrot.slane %v1600_v23, 1 }
 0x34b   : > { %v1666_v55 = vadd.f32 %v1665_v60, %v1664_v10  ;;  %v1649_v25 = vadd.f32 %v1648_v2, %v1647_v41  ;;  %v1617_v16 = vadd.f32 %v1616_v48, %v1615_v30  ;;  %v1634_v7 = vadd.f32 %v1633_v27, %v1632_v58 }
 0x34c   : > { %v1698_v47 = vpop.xlane.xlu0 %1697  ;;  %v1681_v52 = vpop.xlane.xlu1 %1680  ;;  %v1585_v40 = vadd.f32 %v1584_v59, %v1583_v6  ;;  %v1602_v28 = vadd.f32 %v1601_v26, %v1600_v23 }
 0x34d   : > { %v1667_v15 = vrot.slane %v1666_v55, 2  ;;  %v1650_v57 = vrot.slane %v1649_v25, 2  ;;  %v1699_v18 = vrot.slane %v1698_v47, 4  ;;  %v1682_v31 = vrot.slane %v1681_v52, 4 }
 0x34e   : > { %2026 = vpush %v1585_v40  ;;  %v1618_v38 = vrot.slane %v1617_v16, 1  ;;  %v1635_v42 = vrot.slane %v1634_v7, 1 }
 0x34f   : > { %v1700_v19 = vadd.f32 %v1699_v18, %v1698_v47  ;;  %v1683_v51 = vadd.f32 %v1682_v31, %v1681_v52  ;;  %2028 = vpush %v1602_v28  ;;  %v1651_v35 = vadd.f32 %v1650_v57, %v1649_v25  ;;  %v1668_v45 = vadd.f32 %v1667_v15, %v1666_v55 }
 0x350   : > { %v1619_v34 = vadd.f32 %v1618_v38, %v1617_v16  ;;  %v1636_v37 = vadd.f32 %v1635_v42, %v1634_v7 }
 0x351   : > { %v1701_v14 = vrot.slane %v1700_v19, 2  ;;  %v1684_v9 = vrot.slane %v1683_v51, 2  ;;  %v1652_v54 = vrot.slane %v1651_v35, 1  ;;  %v1669_v43 = vrot.slane %v1668_v45, 1 }
 0x352   : > { %2030 = vpush %v1619_v34 }
 0x353   : > { %v1702_v8 = vadd.f32 %v1701_v14, %v1700_v19  ;;  %v1685_v46 = vadd.f32 %v1684_v9, %v1683_v51  ;;  %2032 = vpush %v1636_v37  ;;  %v1653_v24 = vadd.f32 %v1652_v54, %v1651_v35  ;;  %v1670_v61 = vadd.f32 %v1669_v43, %v1668_v45 }
 0x355   : > { %2034 = vpush %v1653_v24  ;;  %v1686_v53 = vrot.slane %v1685_v46, 1  ;;  %v1703_v5 = vrot.slane %v1702_v8, 1 }
 0x356   : > { %2036 = vpush %v1670_v61 }
 0x357   : > { %v1687_v21 = vadd.f32 %v1686_v53, %v1685_v46  ;;  %v1704_v12 = vadd.f32 %v1703_v5, %v1702_v8 }
 0x359   : > { %2038 = vpush %v1687_v21 }
 0x35a   : > { %2040 = vpush %v1704_v12 }
 0x37f   : > { %s2027_s11 = spop %2026 }
 0x380   : > { %s2029_s12 = spop %2028 }
 0x381   : > { %s1604_s13 = sadd.f32 %s2029_s12, %s2027_s11  ;;  %s188_s11 = sand.u32 1, %s2183_s16  }
 0x383   : > { %s2031_s14 = spop %2030 }
 0x384   : > { %s1621_s20 = sadd.f32 %s2031_s14, %s1604_s13  ;;  %s2033_s22 = spop %2032 }
 0x385   : > { %s3037_s13 = sshll.u32 %s188_s11, 7  ;;  %s2008_s14 = sshll.u32 %s2251_s19, 11 }
 0x386   : > { %s1638_s23 = sadd.f32 %s2033_s22, %s1621_s20  ;;  %s2035_s27 = spop %2034 }
 0x387   : > { %s2037_s29 = spop %2036  ;;  %s3059_s20 = scalar_lea.vmem [#allocation2], %s3037_s13 }
 0x388   : > { %s1655_s28 = sadd.f32 %s2035_s27, %s1638_s23  ;;  %s1807_s22 = sshll.u32 %s3059_s20, 4  ;;  %s3089_s22 = int_to_ptr.vmem [resolvable:$true] %s1807_s22 }
 0x389   : > { %s3113_s19 = scalar_lea.sflag [#allocation3], %s188_s11 }
 0x38a   : > { %s1672_s30 = sadd.f32 %s2037_s29, %s1655_s28  ;;  %s2039_s5 = spop %2038 }
 0x38b   : > { %s2041_s7 = spop %2040  ;;  %s3085_s28 = scalar_lea.hbm %s3157_s4, %s2008_s14 }
 0x38c   : > { %s1689_s6 = sadd.f32 %s2039_s5, %s1672_s30  ;;  %s2131_s29 = scalar_lea.vmem %s3089_s22, 2048 }
 0x38d   : > { %p2132_p11 = scmp.ne.s32.totalorder %s3089_s22, %s2131_s29  ;;  %s2202_s30 = smov [#allocation2]  }
 0x38e   : > { %s1706_s8 = sadd.f32 %s2041_s7, %s1689_s6  ;;  %s2135_s5 = sshll.u32 %s2202_s30, 4  ;;  %s2136_s5 = int_to_ptr.vmem [resolvable:$false] %s2135_s5 }
 0x38f   : > { %p2133_p12 = pnand %p2132_p11, %p2268_p5  ;;  %s2137_s6 = scalar_lea.vmem %s2136_s5, 4096 }
 0x390   : > { %s1707_s9 = smul.f32 0.00024414063, %s1706_s8  ;;  %p2138_p0 = scmp.lt.s32.totalorder %s3089_s22, %s2136_s5 }
 0x391   : > { %p2134_p13 = pneg %p2133_p12  ;;  %p2139_p1 = scmp.lt.s32.totalorder %s2137_s6, %s2131_s29 }
 0x392   : > { %s1708_s10 = sadd.f32 1e-05, %s1707_s9 }
 0x393   : > { %p2140_p2 = por %p2139_p1, %p2138_p0 }
 0x394   : > { %v1709_v56 = vstv %s1708_s10 }
 0x395   : > { %2129 = vrsqrt.f32 %v1709_v56  ;;  %p2141_p3 = pnand %p2140_p2, %p2134_p13 }
 0x3a2   : > { %v2130_v3 = vpop.eup %2129 }
 0x3a3   : > { %2042 = vpush %v2130_v3 }
 0x3d4   : > { %s2043_s12 = spop %2042 }
 0x3d5   : > { %v1712_v63 = vstv %s2043_s12 }
 0x3d6   : > { %v1713_v44 = vmul.f32 %v1712_v63, %v2941_v0  ;;  %v1714_v58 = vmul.f32 %v1712_v63, %v2944_v22  ;;  %v1715_v30 = vmul.f32 %v1712_v63, %v2935_v50  ;;  %v1716_v6 = vmul.f32 %v1712_v63, %v2938_v62 }
 0x3d7   : > { %v1717_v23 = vmul.f32 %v1712_v63, %v2953_v20  ;;  %v1718_v10 = vmul.f32 %v1712_v63, %v2956_v49  ;;  %v1719_v41 = vmul.f32 %v1712_v63, %v2947_v32  ;;  %v1720_v27 = vmul.f32 %v1712_v63, %v2950_v33 }
 0x3d8   : > { %v1721_v48 = vmul.f32 %v1712_v63, %v2989_v11  ;;  %v1722_v0 = vmul.f32 %v1712_v63, %v2992_v29  ;;  %v1723_v22 = vmul.f32 %v1712_v63, %v2983_v4  ;;  %v1724_v50 = vmul.f32 %v1712_v63, %v2986_v13 }
 0x3d9   : > { %v1725_v62 = vmul.f32 %v1712_v63, %v3009_v39  ;;  %v1726_v60 = vmul.f32 %v1712_v63, %v3016_v1  ;;  %v3050_v20 = vmul.f32 %v1712_v63, %v2999_v36  ;;  %v3053_v49 = vmul.f32 %v1712_v63, %v3006_v17 }
 0x3da   : > { %vm1729_vm9 = vcmp.ge.f32.partialorder %v1713_v44, 0.0  ;;  %vm1730_vm10 = vcmp.ge.f32.partialorder %v1714_v58, 0.0  ;;  %vm1731_vm11 = vcmp.ge.f32.partialorder %v1715_v30, 0.0  ;;  %vm1732_vm12 = vcmp.ge.f32.partialorder %v1716_v6, 0.0 }
 0x3db   : > { %vm1733_vm13 = vcmp.ge.f32.partialorder %v1717_v23, 0.0  ;;  %vm1734_vm14 = vcmp.ge.f32.partialorder %v1718_v10, 0.0  ;;  %vm1735_vm15 = vcmp.ge.f32.partialorder %v1719_v41, 0.0  ;;  %vm1736_vm0 = vcmp.ge.f32.partialorder %v1720_v27, 0.0 }
 0x3dc   : > { %vm1737_vm1 = vcmp.ge.f32.partialorder %v1721_v48, 0.0  ;;  %vm1738_vm2 = vcmp.ge.f32.partialorder %v1722_v0, 0.0  ;;  %vm1739_vm3 = vcmp.ge.f32.partialorder %v1723_v22, 0.0  ;;  %vm1740_vm4 = vcmp.ge.f32.partialorder %v1724_v50, 0.0 }
 0x3dd   : > { %vm1741_vm5 = vcmp.ge.f32.partialorder %v1725_v62, 0.0  ;;  %vm1742_vm6 = vcmp.ge.f32.partialorder %v1726_v60, 0.0  ;;  %vm1743_vm7 = vcmp.ge.f32.partialorder %v3050_v20, 0.0  ;;  %vm1744_vm8 = vcmp.ge.f32.partialorder %v3053_v49, 0.0 }
 0x3de   : > { %v1745_v32 = vmul.f32 0.2, %v1713_v44  ;;  %v1746_v33 = vmul.f32 0.2, %v1714_v58  ;;  %v1747_v4 = vmul.f32 0.2, %v1715_v30 }
 0x3df   : > { %v1748_v13 = vmul.f32 0.2, %v1716_v6  ;;  %v1749_v11 = vmul.f32 0.2, %v1717_v23  ;;  %v1750_v29 = vmul.f32 0.2, %v1718_v10 }
 0x3e0   : > { %v1751_v36 = vmul.f32 0.2, %v1719_v41  ;;  %v1752_v17 = vmul.f32 0.2, %v1720_v27  ;;  %v1753_v39 = vmul.f32 0.2, %v1721_v48  ;;  %v1761_v1 = vsel %vm1729_vm9, %v1713_v44, %v1745_v32 }
 0x3e1   : > { %v1754_v2 = vmul.f32 0.2, %v1722_v0  ;;  %v1755_v59 = vmul.f32 0.2, %v1723_v22  ;;  %v1756_v26 = vmul.f32 0.2, %v1724_v50  ;;  %v1762_v55 = vsel %vm1730_vm10, %v1714_v58, %v1746_v33  ;;  %1777 = vst [vmem:[%s3059_s20] sm:$0xff] %v1761_v1 }
 0x3e2   : > { %v1757_v25 = vmul.f32 0.2, %v1725_v62  ;;  %v1758_v16 = vmul.f32 0.2, %v1726_v60  ;;  %v1759_v7 = vmul.f32 0.2, %v3050_v20  ;;  %v1763_v47 = vsel %vm1731_vm11, %v1715_v30, %v1747_v4 }
 0x3e3   : > { %1778 = vst [vmem:[%s3059_s20 + $0x8] sm:$0xff] %v1762_v55  ;;  %v1760_v52 = vmul.f32 0.2, %v3053_v49  ;;  %v1764_v40 = vsel %vm1732_vm12, %v1716_v6, %v1748_v13  ;;  %v1765_v28 = vsel %vm1733_vm13, %v1717_v23, %v1749_v11  ;;  %v1766_v15 = vsel %vm1734_vm14, %v1718_v10, %v1750_v29  ;;  %1779 = vst [vmem:[%s3059_s20 + $0x10] sm:$0xff] %v1763_v47 }
 0x3e4   : > { %v1767_v57 = vsel %vm1735_vm15, %v1719_v41, %v1751_v36  ;;  %v1768_v18 = vsel %vm1736_vm0, %v1720_v27, %v1752_v17  ;;  %v1769_v31 = vsel %vm1737_vm1, %v1721_v48, %v1753_v39  ;;  %v1770_v38 = vsel %vm1738_vm2, %v1722_v0, %v1754_v2  ;;  %1780 = vst [vmem:[%s3059_s20 + $0x18] sm:$0xff] %v1764_v40 }
 0x3e5   : > { %1781 = vst [vmem:[%s3059_s20 + $0x20] sm:$0xff] %v1765_v28  ;;  %1782 = vst [vmem:[%s3059_s20 + $0x28] sm:$0xff] %v1766_v15  ;;  %v1771_v42 = vsel %vm1739_vm3, %v1723_v22, %v1755_v59  ;;  %v1772_v19 = vsel %vm1740_vm4, %v1724_v50, %v1756_v26  ;;  %v1773_v51 = vsel %vm1741_vm5, %v1725_v62, %v1757_v25 }
 0x3e6   : > { %v1774_v35 = vsel %vm1742_vm6, %v1726_v60, %v1758_v16  ;;  %1783 = vst [vmem:[%s3059_s20 + $0x30] sm:$0xff] %v1767_v57  ;;  %1784 = vst [vmem:[%s3059_s20 + $0x38] sm:$0xff] %v1768_v18  ;;  %v1775_v45 = vsel %vm1743_vm7, %v3050_v20, %v1759_v7  ;;  %v1776_v34 = vsel %vm1744_vm8, %v3053_v49, %v1760_v52 }
 0x3e7   : > { %1785 = vst [vmem:[%s3059_s20 + $0x40] sm:$0xff] %v1769_v31  ;;  %1786 = vst [vmem:[%s3059_s20 + $0x48] sm:$0xff] %v1770_v38 }
 0x3e8   : > { %1787 = vst [vmem:[%s3059_s20 + $0x50] sm:$0xff] %v1771_v42  ;;  %1788 = vst [vmem:[%s3059_s20 + $0x58] sm:$0xff] %v1772_v19 }
 0x3e9   : > { %1789 = vst [vmem:[%s3059_s20 + $0x60] sm:$0xff] %v1773_v51  ;;  %1790 = vst [vmem:[%s3059_s20 + $0x68] sm:$0xff] %v1774_v35 }
 0x3ea   : > { %1791 = vst [vmem:[%s3059_s20 + $0x70] sm:$0xff] %v1775_v45  ;;  %1792 = vst [vmem:[%s3059_s20 + $0x78] sm:$0xff] %v1776_v34 }
 0x3eb   : > { %2144 = shalt.err (!%p2141_p3)
}
 0x3ec   : > { %s2145_s7 = scalar_lea.hbm %s3085_s28, 2048  ;;  %s2149_s10 = scalar_lea.hbm %s3157_s4, 4096 }
 0x3ed   : > { %p2146_p4 = scmp.ne.s32.totalorder %s3085_s28, %s2145_s7  ;;  %p2150_p9 = scmp.lt.s32.totalorder %s3085_s28, %s3157_s4 }
 0x3ee   : > { %p2151_p10 = scmp.lt.s32.totalorder %s2149_s10, %s2145_s7 }
 0x3ef   : > { %p2147_p7 = pnand %p2146_p4, %p2268_p5 }
 0x3f0   : > { %p2152_p11 = por %p2151_p10, %p2150_p9 }
 0x3f1   : > { %p2148_p8 = pneg %p2147_p7 }
 0x3f3   : > { %p2153_p12 = pnand %p2152_p11, %p2148_p8 }
 0x3f5   : > { %2156 = shalt.err (!%p2153_p12)
}
 0x3f6   : > { %s2203_s13 = smov 256   ;;  %s2204_s14 = smov 16  }
 0x3f7   : > { %2044 = dma.vmem_to_hbm [thread:$0]  (%p2268_p5), %s3089_s22, 2048, %s3085_s28, %s3113_s19, %s2203_s13, %s2203_s13, %s2204_s14  }
 0x3f8 PF: > { %p2050_p13 = scmp.ge.s32.totalorder %s2191_s18, 2  ;;  %s1822_s20 = sand.u32 1, %s2179_s15  }
 0x3f9   : > { %s1823_s23 = scalar_lea.sflag [#allocation3], %s1822_s20 }
 0x3fa   : > { %p2047_p0 = pnand %p2050_p13, %p2272_p6 }
 0x3fc   : > { %p2048_p1 = pneg %p2047_p0 }
 0x3fe   : > { %2174 = dma.done.wait (%p2048_p1), %s1823_s23, 2048  }
 0x3ff   : > { %2176 = vsyncadd (%p2048_p1), %s1823_s23, 4294965248  ;;  %p14_p2 = scmp.ge.s32.totalorder %s2255_s21, 4   ;;  %s3259_s15 = smov %s2183_s16 }
 0x400   : > { %s3260_s16 = smov %s2187_s17  ;;  %s3261_s17 = smov %s2266_s24 }
 0x401   : > { %s3262_s18 = smov %s2255_s21  ;;  %16 = sbr.rel (!%p14_p2) target bundleno = 3 (0x3), region = 78 }
 0x406   :  { %1828 = vsyncpa [#allocation3], 1 }
 0x407   :  { %1830 = vsyncpa [#allocation3 + $0x1], 1 }

</bundles_post_ra>
